<compile_context>
chip_gen: v7x
topology: tpu7x:2x2x1
jax: 0.10.0
libtpu: 0.0.40
codegen_flags: <defaults>
</compile_context>

<pallas_src>
import functools

import jax
import jax.numpy as jnp
from jax.experimental import pallas as pl
from jax.experimental.pallas import tpu as pltpu


def _mha_map_kernel(q_ref, k_ref, wqT_ref, bq_ref, wk_ref, bk_ref, out_ref,
                    kproj_ref, *, num_heads, head_dim, hw_valid,
                    cache_k_proj, approx_recip):
    """One (batch, query-tile) grid step.

    q_ref     : (tq, D)             query tile (compute dtype: bf16 default / f32)
    k_ref     : (D, HW_pad)         NCHW-flattened spatial features (native layout)
    wqT_ref   : (D, hidden)         pre-transposed q weight, norm folded in
    bq_ref    : (1, hidden)         q bias (f32), norm folded in
    wk_ref    : (hidden, D)         k weight, used as Wk @ k (no transpose needed)
    bk_ref    : (hidden, 1)         k bias (f32)
    out_ref   : (tq, heads, HW_pad) joint softmax over (heads, hw_valid)
    kproj_ref : (hidden, HW_pad)    VMEM scratch carried across q tiles of a batch
    """
    n, c = num_heads, head_dim
    cdt = q_ref.dtype
    hw = kproj_ref.shape[1]

    # k projection (largest MXU op): compute once per batch element, cache it
    # in VMEM scratch across the (sequential, "arbitrary") q-tile axis.
    def _compute_kproj():
        kp = jnp.dot(wk_ref[...], k_ref[...],
                     preferred_element_type=jnp.float32) + bk_ref[...]
        kproj_ref[...] = kp.astype(kproj_ref.dtype)

    if cache_k_proj:
        @pl.when(pl.program_id(1) == 0)
        def _():
            _compute_kproj()
    else:
        _compute_kproj()

    # q projection: full-D MXU matmul with f32 accumulation, f32 bias add.
    q_proj = jnp.dot(q_ref[...], wqT_ref[...],
                     preferred_element_type=jnp.float32) + bq_ref[...]       # (tq, hidden)
    tq = q_proj.shape[0]

    # Head-batched logits: one dot_general batched over heads (K = head_dim).
    # NOTE: K = head_dim only fills part of the MXU's systolic depth; that is
    # the expected utilization floor — bf16 operands already cut its cycles.
    qh = jnp.transpose(q_proj.astype(cdt).reshape(tq, n, c), (1, 0, 2))      # (n, tq, c)
    kh = kproj_ref[...].reshape(n, c, hw)                                    # (n, c, hw)
    scores = jax.lax.dot_general(
        qh, kh, dimension_numbers=(((2,), (1,)), ((0,), (0,))),
        preferred_element_type=jnp.float32)                                  # (n, tq, hw)

    # HW was padded to a lane multiple in the wrapper: mask padded columns to
    # -inf so they contribute nothing to the joint softmax denominator.
    if hw > hw_valid:
        col = jax.lax.broadcasted_iota(jnp.int32, scores.shape, 2)
        scores = jnp.where(col < hw_valid, scores, -jnp.inf)

    # Fused joint softmax over (heads, H*W) per query row, computed directly
    # in the batched (n, tq, hw) layout: the head reduce (axis 0) is a pure
    # VPU leading-dim reduce; only the HW reduce touches the XLU.  No
    # full-slab transpose before the reductions.
    m = jnp.max(jnp.max(scores, axis=2, keepdims=True), axis=0, keepdims=True)  # (1, tq, 1)
    e = jnp.exp(scores - m)
    denom = jnp.sum(jnp.sum(e, axis=2, keepdims=True), axis=0, keepdims=True)   # (1, tq, 1)
    if approx_recip:
        probs = e * pl.reciprocal(denom, approx=True)
    else:
        probs = e / denom            # denom is tiny; exact path keeps row sums == 1

    # Single transpose of the already-normalized, already-downcast tensor,
    # followed by one wide lane-dense store.
    out_ref[...] = jnp.transpose(probs.astype(out_ref.dtype), (1, 0, 2))
    # TODO(synk): optional key-padding `mask` argument of MHAttentionMap
    # (masked_fill(-inf) before the softmax) is not implemented (mask=None path).


def mh_attention_map(q, k_nchw, wq, bq, wk, bk, num_heads, *,
                     q_block=None,
                     compute_dtype=jnp.bfloat16,
                     out_dtype=jnp.float32,
                     cache_k_proj=True,
                     approx_recip=False,
                     vmem_limit_bytes=None):
    """weights = softmax over (heads, H, W) of norm * (Wq q) . (Wk *_1x1 k)."""
    B, Q, D = q.shape
    _, Dk, H, W = k_nchw.shape
    assert Dk == D
    hidden = wq.shape[0]
    head_dim = hidden // num_heads
    assert head_dim * num_heads == hidden
    norm = float(hidden / num_heads) ** (-0.5)

    HW = H * W
    HW_pad = ((HW + 127) // 128) * 128            # lane-dense, unmasked output stores

    if q_block is None:
        q_block = Q                               # whole-Q tile: one step per batch elem
    n_q_tiles = pl.cdiv(Q, q_block)
    Q_pad = n_q_tiles * q_block
    assert q_block == Q_pad or q_block % 8 == 0, \
        "q_block must be a multiple of 8 (or cover all of Q)"

    cdt = jnp.dtype(compute_dtype)

    # k stays in its native NCHW layout: (B, D, H, W) -> (B, D, H*W) is a pure
    # reshape.  Pad spatial columns with zeros to a lane multiple; the kernel
    # masks them to -inf before the softmax.
    k_flat = k_nchw.reshape(B, D, HW)
    if HW_pad != HW:
        k_flat = jnp.pad(k_flat, ((0, 0), (0, 0), (0, HW_pad - HW)))
    k_flat = k_flat.astype(cdt)

    q_in = q
    if Q_pad != Q:
        q_in = jnp.pad(q_in, ((0, 0), (0, Q_pad - Q), (0, 0)))
    q_in = q_in.astype(cdt)

    # Pre-transpose Wq and fold the 1/sqrt(head_dim) normalization into Wq/bq
    # so the kernel never transposes weights or rescales per head.
    wqT = (wq * norm).T.astype(cdt)                          # (D, hidden)
    bq2 = (bq * norm).reshape(1, hidden).astype(jnp.float32)
    wk_in = wk.astype(cdt)                                   # (hidden, D): k_proj = Wk @ k
    bk2 = bk.reshape(hidden, 1).astype(jnp.float32)

    kernel = functools.partial(
        _mha_map_kernel, num_heads=num_heads, head_dim=head_dim,
        hw_valid=HW, cache_k_proj=cache_k_proj, approx_recip=approx_recip)

    # Carried k_proj scratch requires a sequential q axis ("arbitrary").  Set
    # cache_k_proj=False to make it "parallel" (e.g. B == 1 on v7x's 2 cores).
    dim_sem = ("parallel", "arbitrary") if cache_k_proj else ("parallel", "parallel")

    out = pl.pallas_call(
        kernel,
        out_shape=jax.ShapeDtypeStruct((B, Q_pad, num_heads, HW_pad),
                                       jnp.dtype(out_dtype)),
        grid=(B, n_q_tiles),
        in_specs=[
            pl.BlockSpec((None, q_block, D), lambda b, qi: (b, qi, 0)),   # q tile
            pl.BlockSpec((None, D, HW_pad), lambda b, qi: (b, 0, 0)),     # k (resident across q tiles)
            pl.BlockSpec((D, hidden), lambda b, qi: (0, 0)),              # Wq^T (norm folded)
            pl.BlockSpec((1, hidden), lambda b, qi: (0, 0)),              # bq   (norm folded)
            pl.BlockSpec((hidden, D), lambda b, qi: (0, 0)),              # Wk
            pl.BlockSpec((hidden, 1), lambda b, qi: (0, 0)),              # bk
        ],
        out_specs=pl.BlockSpec((None, q_block, num_heads, HW_pad),
                               lambda b, qi: (b, qi, 0, 0)),
        scratch_shapes=[pltpu.VMEM((hidden, HW_pad), cdt)],               # cached k_proj
        compiler_params=pltpu.CompilerParams(
            dimension_semantics=dim_sem,
            # For real DETR shapes raise this explicitly (64-96 MiB on v6e;
            # budget <= ~48 MiB on v7x's 64 MiB VMEM, or tile HW there).
            vmem_limit_bytes=vmem_limit_bytes),
    )(q_in, k_flat, wqT, bq2, wk_in, bk2)

    if Q_pad != Q or HW_pad != HW:
        out = out[:, :Q, :, :HW]
    # (B, Q, heads, H*W) -> (B, Q, heads, H, W); dropout(p=0.0) is the identity.
    return out.reshape(B, Q, num_heads, H, W)


def mh_attention_map_reference(q, k_nchw, wq, bq, wk, bk, num_heads):
    """Pure-JAX reference mirroring the PyTorch forward exactly (mask=None)."""
    B, Q, D = q.shape
    hidden = wq.shape[0]
    c = hidden // num_heads
    H, W = k_nchw.shape[2], k_nchw.shape[3]
    norm = float(hidden / num_heads) ** (-0.5)
    qp = q @ wq.T + bq                                                 # (B, Q, hidden)
    kp = jnp.einsum('bdhw,ed->behw', k_nchw, wk) + bk[None, :, None, None]
    qh = qp.reshape(B, Q, num_heads, c)
    kh = kp.reshape(B, num_heads, c, H, W)
    w = jnp.einsum('bqnc,bnchw->bqnhw', qh * norm, kh)
    sm = jax.nn.softmax(w.reshape(B, Q, -1), axis=-1)
    return sm.reshape(w.shape)


if __name__ == "__main__":
    # Small shapes consistent with the module's forward (real DETR: hidden=256,
    # nheads=8; here hidden=128 keeps head_dim=16, bf16 sublane-pack friendly).
    B, Q = 2, 16           # batch, number of object queries
    query_dim = 128        # == channels of the conv feature map (hidden_dim)
    hidden_dim = 128
    num_heads = 8          # head_dim = 16
    H = W = 16             # H*W = 256 (multiple of 128 -> lane-dense output)

    key = jax.random.PRNGKey(0)
    k_q, k_k, k_wq, k_wk, k_bq, k_bk, k_k2 = jax.random.split(key, 7)

    # Xavier-uniform weights (as in __init__); small non-zero biases so the
    # bias path of the kernel is actually exercised.
    bound = (6.0 / (query_dim + hidden_dim)) ** 0.5
    wq = jax.random.uniform(k_wq, (hidden_dim, query_dim), jnp.float32, -bound, bound)
    wk = jax.random.uniform(k_wk, (hidden_dim, query_dim), jnp.float32, -bound, bound)
    bq = 0.1 * jax.random.normal(k_bq, (hidden_dim,), jnp.float32)
    bk = 0.1 * jax.random.normal(k_bk, (hidden_dim,), jnp.float32)

    # Inputs: q is (B, Q, query_dim); k is NCHW (B, query_dim, H, W).
    q = jax.random.normal(k_q, (B, Q, query_dim), jnp.float32)
    k = jax.random.normal(k_k, (B, query_dim, H, W), jnp.float32)

    ref = mh_attention_map_reference(q, k, wq, bq, wk, bk, num_heads)

    # 1) Default fast path: bf16 MXU operands, f32 accumulation + f32 softmax,
    #    f32 output, whole-Q tile.
    out = jax.block_until_ready(mh_attention_map(q, k, wq, bq, wk, bk, num_heads))
    assert out.shape == (B, Q, num_heads, H, W)
    assert jnp.allclose(out, ref, rtol=1e-1, atol=2e-3), "bf16 path mismatch vs reference"

    # 2) f32 operands with two q tiles per batch element: exercises the cached
    #    k_proj scratch and the "arbitrary" q axis; exact softmax denominator.
    out_f32 = jax.block_until_ready(
        mh_attention_map(q, k, wq, bq, wk, bk, num_heads,
                         q_block=8, compute_dtype=jnp.float32))
    assert jnp.allclose(out_f32, ref, rtol=2e-3, atol=1e-6), "f32 path mismatch vs reference"
    row_sums = out_f32.reshape(B, Q, -1).sum(-1)
    assert jnp.allclose(row_sums, 1.0, atol=1e-4), "softmax rows must sum to 1"

    # 3) Non-lane-aligned spatial size (HW = 100 -> padded to 128 + -inf mask)
    #    with bf16 output (halves the attention-map writeback traffic).
    H2 = W2 = 10
    k2 = jax.random.normal(k_k2, (B, query_dim, H2, W2), jnp.float32)
    ref2 = mh_attention_map_reference(q, k2, wq, bq, wk, bk, num_heads)
    out2 = jax.block_until_ready(
        mh_attention_map(q, k2, wq, bq, wk, bk, num_heads,
                         compute_dtype=jnp.float32, out_dtype=jnp.bfloat16))
    assert out2.shape == (B, Q, num_heads, H2, W2)
    assert jnp.allclose(out2.astype(jnp.float32), ref2, rtol=2e-2, atol=1e-3), \
        "padded-HW / bf16-output path mismatch vs reference"

    print("KERNEL_OK")
</pallas_src>

<mosaic_0001>
module attributes {stable_mosaic.version = 11 : i64} {
  func.func @_mha_map_kernel(%arg0: i32, %arg1: i32, %arg2: memref<1x16x128xbf16, #tpu.memory_space<vmem>>, %arg3: memref<1x128x256xbf16, #tpu.memory_space<vmem>>, %arg4: memref<128x128xbf16, #tpu.memory_space<vmem>>, %arg5: memref<1x128xf32, #tpu.memory_space<vmem>>, %arg6: memref<128x128xbf16, #tpu.memory_space<vmem>>, %arg7: memref<128x1xf32, #tpu.memory_space<vmem>>, %arg8: memref<1x16x8x256xf32, #tpu.memory_space<vmem>>, %arg9: memref<128x256xbf16, #tpu.memory_space<vmem>>) attributes {dimension_semantics = [#tpu.dimension_semantics<parallel>, #tpu.dimension_semantics<arbitrary>], iteration_bounds = array<i64: 2, 1>, scalar_prefetch = 0 : i64, scratch_operands = 1 : i64, tpu.core_type = #tpu.core_type<tc>, window_params = [{transform_indices = @transform_0, window_bounds = array<i64: 1, 16, 128>}, {transform_indices = @transform_1, window_bounds = array<i64: 1, 128, 256>}, {pipeline_mode = #tpu.pipeline_mode<synchronous>, transform_indices = @transform_2, window_bounds = array<i64: 128, 128>}, {pipeline_mode = #tpu.pipeline_mode<synchronous>, transform_indices = @transform_3, window_bounds = array<i64: 1, 128>}, {pipeline_mode = #tpu.pipeline_mode<synchronous>, transform_indices = @transform_4, window_bounds = array<i64: 128, 128>}, {pipeline_mode = #tpu.pipeline_mode<synchronous>, transform_indices = @transform_5, window_bounds = array<i64: 128, 1>}, {transform_indices = @transform_6, window_bounds = array<i64: 1, 16, 8, 256>}]} {
    %c0_i32 = arith.constant 0 : i32
    %0 = arith.cmpi eq, %arg1, %c0_i32 : i32
    %1 = arith.extui %0 : i1 to i32
    %c0_i32_0 = arith.constant 0 : i32
    %2 = arith.cmpi ne, %1, %c0_i32_0 : i32
    scf.if %2 {
      %c0_18 = arith.constant 0 : index
      %c0_19 = arith.constant 0 : index
      %33 = vector.load %arg6[%c0_18, %c0_19] : memref<128x128xbf16, #tpu.memory_space<vmem>>, vector<128x128xbf16>
      %c0_20 = arith.constant 0 : index
      %c0_21 = arith.constant 0 : index
      %c0_22 = arith.constant 0 : index
      %34 = vector.load %arg3[%c0_20, %c0_21, %c0_22] : memref<1x128x256xbf16, #tpu.memory_space<vmem>>, vector<1x128x256xbf16>
      %35 = vector.shape_cast %34 : vector<1x128x256xbf16> to vector<128x256xbf16>
      %cst_23 = arith.constant dense<0.000000e+00> : vector<128x256xf32>
      %36 = tpu.matmul %33, %35, %cst_23 {dimension_numbers = #tpu.dot_dimension_numbers<[1], [0], [0], [1], [0, 0, 1, 1], [], []>} : vector<128x128xbf16>, vector<128x256xbf16>, vector<128x256xf32> -> vector<128x256xf32>
      %c0_24 = arith.constant 0 : index
      %c0_25 = arith.constant 0 : index
      %37 = vector.load %arg7[%c0_24, %c0_25] : memref<128x1xf32, #tpu.memory_space<vmem>>, vector<128x1xf32>
      %38 = vector.broadcast %37 : vector<128x1xf32> to vector<128x256xf32>
      %39 = arith.addf %36, %38 : vector<128x256xf32>
      %40 = arith.truncf %39 : vector<128x256xf32> to vector<128x256xbf16>
      %c0_26 = arith.constant 0 : index
      %c0_27 = arith.constant 0 : index
      %41 = vector.load %arg9[%c0_26, %c0_27] : memref<128x256xbf16, #tpu.memory_space<vmem>>, vector<128x256xbf16>
      tpu.vector_store %arg9[%c0_26, %c0_27], %40 {strides = array<i32>} : memref<128x256xbf16, #tpu.memory_space<vmem>>, vector<128x256xbf16>,
    } else {
    }
    %c0 = arith.constant 0 : index
    %c0_1 = arith.constant 0 : index
    %c0_2 = arith.constant 0 : index
    %3 = vector.load %arg2[%c0, %c0_1, %c0_2] : memref<1x16x128xbf16, #tpu.memory_space<vmem>>, vector<1x16x128xbf16>
    %4 = vector.shape_cast %3 : vector<1x16x128xbf16> to vector<16x128xbf16>
    %c0_3 = arith.constant 0 : index
    %c0_4 = arith.constant 0 : index
    %5 = vector.load %arg4[%c0_3, %c0_4] : memref<128x128xbf16, #tpu.memory_space<vmem>>, vector<128x128xbf16>
    %cst = arith.constant dense<0.000000e+00> : vector<16x128xf32>
    %6 = tpu.matmul %4, %5, %cst {dimension_numbers = #tpu.dot_dimension_numbers<[1], [0], [0], [1], [0, 0, 1, 1], [], []>} : vector<16x128xbf16>, vector<128x128xbf16>, vector<16x128xf32> -> vector<16x128xf32>
    %c0_5 = arith.constant 0 : index
    %c0_6 = arith.constant 0 : index
    %7 = vector.load %arg5[%c0_5, %c0_6] : memref<1x128xf32, #tpu.memory_space<vmem>>, vector<1x128xf32>
    %8 = vector.broadcast %7 : vector<1x128xf32> to vector<16x128xf32>
    %9 = arith.addf %6, %8 : vector<16x128xf32>
    %10 = arith.truncf %9 : vector<16x128xf32> to vector<16x128xbf16>
    %11 = vector.shape_cast %10 : vector<16x128xbf16> to vector<16x8x16xbf16>
    %12 = tpu.transpose %11, [1, 0, 2] : vector<16x8x16xbf16> -> vector<8x16x16xbf16>
    %c0_7 = arith.constant 0 : index
    %c0_8 = arith.constant 0 : index
    %13 = vector.load %arg9[%c0_7, %c0_8] : memref<128x256xbf16, #tpu.memory_space<vmem>>, vector<128x256xbf16>
    %14 = vector.shape_cast %13 : vector<128x256xbf16> to vector<8x16x256xbf16>
    %cst_9 = arith.constant dense<0.000000e+00> : vector<8x16x256xf32>
    %15 = tpu.matmul %12, %14, %cst_9 {dimension_numbers = #tpu.dot_dimension_numbers<[2], [1], [1], [2], [0, 0, 0, 1, 1, 2], [0], [0]>} : vector<8x16x16xbf16>, vector<8x16x256xbf16>, vector<8x16x256xf32> -> vector<8x16x256xf32>
    %cst_10 = arith.constant dense<0xFF800000> : vector<8x16xf32>
    %16 = vector.multi_reduction <maximumf>, %15, %cst_10 [2] : vector<8x16x256xf32> to vector<8x16xf32>
    %17 = vector.shape_cast %16 : vector<8x16xf32> to vector<8x16x1xf32>
    %cst_11 = arith.constant dense<0xFF800000> : vector<16x1xf32>
    %18 = vector.multi_reduction <maximumf>, %17, %cst_11 [0] : vector<8x16x1xf32> to vector<16x1xf32>
    %19 = vector.shape_cast %18 : vector<16x1xf32> to vector<1x16x1xf32>
    %20 = vector.broadcast %19 : vector<1x16x1xf32> to vector<8x16x256xf32>
    %21 = arith.subf %15, %20 : vector<8x16x256xf32>
    %22 = math.exp %21 : vector<8x16x256xf32>
    %cst_12 = arith.constant dense<0.000000e+00> : vector<8x16xf32>
    %23 = vector.multi_reduction <add>, %22, %cst_12 [2] : vector<8x16x256xf32> to vector<8x16xf32>
    %24 = vector.shape_cast %23 : vector<8x16xf32> to vector<8x16x1xf32>
    %cst_13 = arith.constant dense<0.000000e+00> : vector<16x1xf32>
    %25 = vector.multi_reduction <add>, %24, %cst_13 [0] : vector<8x16x1xf32> to vector<16x1xf32>
    %26 = vector.shape_cast %25 : vector<16x1xf32> to vector<1x16x1xf32>
    %27 = vector.broadcast %26 : vector<1x16x1xf32> to vector<8x16x256xf32>
    %28 = arith.divf %22, %27 : vector<8x16x256xf32>
    %29 = tpu.transpose %28, [1, 0, 2] : vector<8x16x256xf32> -> vector<16x8x256xf32>
    %c0_14 = arith.constant 0 : index
    %c0_15 = arith.constant 0 : index
    %c0_16 = arith.constant 0 : index
    %c0_17 = arith.constant 0 : index
    %30 = vector.load %arg8[%c0_14, %c0_15, %c0_16, %c0_17] : memref<1x16x8x256xf32, #tpu.memory_space<vmem>>, vector<1x16x8x256xf32>
    %31 = vector.shape_cast %30 : vector<1x16x8x256xf32> to vector<16x8x256xf32>
    %32 = vector.shape_cast %29 : vector<16x8x256xf32> to vector<1x16x8x256xf32>
    tpu.vector_store %arg8[%c0_14, %c0_15, %c0_16, %c0_17], %32 {strides = array<i32>} : memref<1x16x8x256xf32, #tpu.memory_space<vmem>>, vector<1x16x8x256xf32>,
    return
  }
  func.func @transform_0(%arg0: i32, %arg1: i32) -> (i32, i32, i32) {
    %c0_i32 = arith.constant 0 : i32
    %c0_i32_0 = arith.constant 0 : i32
    return %arg0, %arg1, %c0_i32 : i32, i32, i32
  }
  func.func @transform_1(%arg0: i32, %arg1: i32) -> (i32, i32, i32) {
    %c0_i32 = arith.constant 0 : i32
    %c0_i32_0 = arith.constant 0 : i32
    %c0_i32_1 = arith.constant 0 : i32
    return %arg0, %c0_i32, %c0_i32_0 : i32, i32, i32
  }
  func.func @transform_2(%arg0: i32, %arg1: i32) -> (i32, i32) {
    %c0_i32 = arith.constant 0 : i32
    %c0_i32_0 = arith.constant 0 : i32
    %c0_i32_1 = arith.constant 0 : i32
    return %c0_i32, %c0_i32_0 : i32, i32
  }
  func.func @transform_3(%arg0: i32, %arg1: i32) -> (i32, i32) {
    %c0_i32 = arith.constant 0 : i32
    %c0_i32_0 = arith.constant 0 : i32
    %c0_i32_1 = arith.constant 0 : i32
    return %c0_i32, %c0_i32_0 : i32, i32
  }
  func.func @transform_4(%arg0: i32, %arg1: i32) -> (i32, i32) {
    %c0_i32 = arith.constant 0 : i32
    %c0_i32_0 = arith.constant 0 : i32
    %c0_i32_1 = arith.constant 0 : i32
    return %c0_i32, %c0_i32_0 : i32, i32
  }
  func.func @transform_5(%arg0: i32, %arg1: i32) -> (i32, i32) {
    %c0_i32 = arith.constant 0 : i32
    %c0_i32_0 = arith.constant 0 : i32
    %c0_i32_1 = arith.constant 0 : i32
    return %c0_i32, %c0_i32_0 : i32, i32
  }
  func.func @transform_6(%arg0: i32, %arg1: i32) -> (i32, i32, i32, i32) {
    %c0_i32 = arith.constant 0 : i32
    %c0_i32_0 = arith.constant 0 : i32
    %c0_i32_1 = arith.constant 0 : i32
    return %arg0, %arg1, %c0_i32, %c0_i32_0 : i32, i32, i32, i32
  }
}

</mosaic_0001>

<bundles_post_ra>
// kernel: tpu_custom_call.1
= control target key start
LH: loop header
LB: loop body
LE: loop exit
PB: predicated region body
PF: predicated region fallthrough
CT: control target
= control target key end

     0   :  { %s4085_s0 = inlined_call_operand.hbm [shape: bf16[2,16,128], index: 0, kind: input, shape index: {}]   ;;  %s4086_s1 = inlined_call_operand.hbm [shape: bf16[2,128,256], index: 1, kind: input, shape index: {}]   ;;  %s4087_s2 = inlined_call_operand.vmem [shape: bf16[128,128], index: 2, kind: input, shape index: {}]   ;;  %s4088_s3 = inlined_call_operand.vmem [shape: f32[1,128], index: 3, kind: input, shape index: {}]   ;;  %s4089_s4 = inlined_call_operand.vmem [shape: bf16[128,128], index: 4, kind: input, shape index: {}]   ;;  %s4090_s5 = inlined_call_operand.vmem [shape: f32[128,1], index: 5, kind: input, shape index: {}]   ;;  %s4091_s6 = inlined_call_operand.hbm [shape: f32[2,16,8,256], index: 6, kind: output, shape index: {}]  }
   0x1   :  { %4097 = sst [smem:[#allocation13_spill]] %s4085_s0 }
   0x2   :  { %11 = vsyncpa [#allocation4], 0 }
   0x3   :  { %13 = vsyncpa [#allocation4 + $0x1], 0 }
   0x4   :  { %14 = vsyncpa [#allocation7], 0 }
   0x5   :  { %16 = vsyncpa [#allocation7 + $0x1], 0 }
   0x6   :  { %17 = vsyncpa [#allocation5], 0 }
   0x7   :  { %19 = vsyncpa [#allocation5 + $0x1], 0  ;;  %s3037_s21 = smov 0   ;;  %s3039_s22 = smov 0  }
   0x8   :  { %s3041_s23 = smov 0   ;;  %s3043_s24 = smov 0  }
   0x9   :  { %s3045_s25 = smov 0   ;;  %s3047_s26 = smov 0  }
   0xa LB: > { %s2542_s27 = sadd.s32 4294967295, %s2980_s26   ;;  %s2543_s28 = sadd.s32 4294967294, %s2980_s26   ;;  %s2980_s26 = sphi %s3047_s26, %s25_s26   ;;  %s2976_s25 = sphi %s3045_s25, %s4117_s25   ;;  %s2972_s24 = sphi %s3043_s24, %s4116_s24   ;;  %s2968_s23 = sphi %s3041_s23, %s4115_s23   ;;  %s2964_s22 = sphi %s3039_s22, %s4114_s22   ;;  %s2960_s21 = sphi %s3037_s21, %s4113_s21  }
   0xb   : > { %s37_s29 = sadd.s32 1, %s2976_s25  ;;  %s46_s30 = sadd.s32 1, %s2968_s23 }
   0xc   : > { %p39_p0 = scmp.ge.s32.totalorder %s37_s29, 2  ;;  %p53_p1 = scmp.ne.s32.totalorder %s2968_s23, %s2964_s22 }
   0xd   : > { %p54_p2 = scmp.eq.s32.totalorder %s2980_s26, 0  ;;  %p59_p3 = scmp.ne.s32.totalorder %s2964_s22, %s2960_s21 }
   0xe   : > { %s4119_s29 = smov (%p39_p0, %s37_s29), 0  ;;  %p60_p5 = scmp.eq.s32.totalorder %s2542_s27, 0 }
   0xf   : > { %4098 = sst [smem:[#allocation12_spill]] %s4119_s29  ;;  %p3078_p4 = por %p54_p2, %p53_p1 }
  0x10   : > { %s41_s8 = ssub.s32 %s2976_s25, %s4119_s29  ;;  %p195_p6 = scmp.eq.s32.totalorder %s2542_s27, 1 }
  0x11   : > { %p44_p7 = scmp.eq.s32.totalorder %s41_s8, 0  ;;  %p3084_p8 = por %p60_p5, %p59_p3 }
  0x12   : > { %p3088_p9 = por %p195_p6, %p53_p1  ;;  %p201_p10 = scmp.eq.s32.totalorder %s2543_s28, 1 }
  0x13   : > { %s4100_s9 = scalar_select %p3084_p8, 1, 0 }
  0x14   : > { %s4101_s10 = scalar_select %p3088_p9, 1, 0 }
  0x15   : > { %s3093_s11 = scalar_select %p44_p7, %s2968_s23, %s46_s30  }
  0x16   : > { %p3095_p11 = por %p201_p10, %p59_p3  ;;  %p2656_p13 = scmp.lt.s32.totalorder %s2980_s26, 2 }
  0x17   : > { %s3102_s13 = sand.u32 1, %s2968_s23   ;;  %s2607_s15 = sshll.u32 %s2976_s25, 7 }
  0x18   : > { %s4102_s12 = scalar_select %p3095_p11, 1, 0 }
  0x19   : > { %s2546_s14 = sshll.u32 %s3102_s13, 3  ;;  %s4103_s0 = sld [smem:[#allocation13_spill]] }
  0x1a   : > { %s237_s19 = scalar_lea.vmem [#allocation3], %s2546_s14  ;;  %p3115_p0 = pnand %p2656_p13, %p3078_p4 }
  0x1b   : > { %s246_s20 = sshll.u32 %s237_s19, 4  ;;  %s234_s28 = scalar_lea.sflag [#allocation4], %s3102_s13  ;;  %s3111_s20 = int_to_ptr.vmem [resolvable:$true] %s246_s20 }
  0x1c   : > { %p2836_p3 = pneg %p3115_p0 }
  0x1f   : > { %s3109_s18 = scalar_lea.hbm %s4103_s0, %s2607_s15  ;;  %s2839_s7 = scalar_lea.hbm %s4103_s0, 256 }
  0x20   : > { %s2834_s30 = scalar_lea.hbm %s3109_s18, 128  ;;  %p2840_p4 = scmp.lt.u32.totalorder %s3109_s18, %s4103_s0 }
  0x21   : > { %p2835_p2 = scmp.ne.s32.totalorder %s3109_s18, %s2834_s30  ;;  %p2841_p7 = scmp.lt.u32.totalorder %s2839_s7, %s2834_s30 }
  0x22   : > { %p2843_p13 = scmp.lt.u32.totalorder %s2834_s30, %s3109_s18 }
  0x23   : > { %p2837_p5 = pnand %p2836_p3, %p2835_p2  ;;  %p2842_p10 = por %p2841_p7, %p2840_p4 }
  0x25   : > { %p2838_p6 = pneg %p2837_p5  ;;  %p2844_p12 = por %p2843_p13, %p2842_p10 }
  0x27   : > { %p2845_p1 = pnand %p2844_p12, %p2838_p6 }
  0x29   : > { %2848 = shalt.err (!%p2845_p1)
}
  0x2a   : > { %s2849_s17 = scalar_lea.vmem %s3111_s20, 128  ;;  %s2982_s19 = smov [#allocation3]  }
  0x2b   : > { %p2850_p2 = scmp.ne.s32.totalorder %s3111_s20, %s2849_s17  ;;  %s2854_s8 = sshll.u32 %s2982_s19, 4  ;;  %s2855_s8 = int_to_ptr.vmem [resolvable:$false] %s2854_s8 }
  0x2c   : > { %s2856_s14 = scalar_lea.vmem %s2855_s8, 256  ;;  %p2857_p9 = scmp.lt.s32.totalorder %s3111_s20, %s2855_s8 }
  0x2d   : > { %p2852_p5 = pnand %p2850_p2, %p2836_p3  ;;  %p2858_p4 = scmp.lt.s32.totalorder %s2856_s14, %s2849_s17 }
  0x2f   : > { %p2853_p11 = pneg %p2852_p5  ;;  %p2859_p7 = por %p2858_p4, %p2857_p9 }
  0x31   : > { %p2860_p10 = pnand %p2859_p7, %p2853_p11 }
  0x33   : > { %2863 = shalt.err (!%p2860_p10)
}
  0x34   : > { %s2983_s30 = smov 64   ;;  %s2984_s7 = smov 4  }
  0x35   : > { %2648 = dma.hbm_to_vmem [thread:$0]  (!%p3115_p0), %s3109_s18, 128, %s3111_s20, %s234_s28, %s2983_s30, %s2983_s30, %s2984_s7  }
  0x36   : > { %p275_p12 = scmp.lt.s32.totalorder %s2980_s26, 3  ;;  %s2549_s15 = sshll.u32 %s3102_s13, 7 }
  0x37   : > { %s2608_s16 = sshll.u32 %s2976_s25, 11  ;;  %p4105_p9 = scmp.ge.s32.totalorder %s2980_s26, 1 }
  0x38   : > { %s3160_s14 = scalar_lea.hbm %s4086_s1, %s2608_s16  ;;  %s260_s0 = scalar_lea.vmem [#allocation6], %s2549_s15 }
  0x39   : > { %p3153_p11 = pnand %p4105_p9, %p275_p12  ;;  %s267_s29 = sshll.u32 %s260_s0, 4  ;;  %s3162_s29 = int_to_ptr.vmem [resolvable:$true] %s267_s29 }
  0x3a   : > { %s257_s18 = scalar_lea.sflag [#allocation7], %s3102_s13  ;;  %s2864_s20 = scalar_lea.hbm %s3160_s14, 2048 }
  0x3b   : > { %p2865_p1 = scmp.ne.s32.totalorder %s3160_s14, %s2864_s20  ;;  %s2869_s7 = scalar_lea.hbm %s4086_s1, 4096 }
  0x3c   : > { %p2870_p2 = scmp.lt.u32.totalorder %s3160_s14, %s4086_s1  ;;  %p2871_p5 = scmp.lt.u32.totalorder %s2869_s7, %s2864_s20 }
  0x3d   : > { %p2867_p6 = pnand %p2865_p1, %p2836_p3  ;;  %p2873_p7 = scmp.lt.u32.totalorder %s2864_s20, %s3160_s14 }
  0x3e   : > { %p2872_p4 = por %p2871_p5, %p2870_p2 }
  0x3f   : > { %p2868_p13 = pneg %p2867_p6 }
  0x40   : > { %p2874_p10 = por %p2873_p7, %p2872_p4 }
  0x42   : > { %p2875_p12 = pnand %p2874_p10, %p2868_p13 }
  0x44   : > { %2878 = shalt.err (!%p2875_p12)
}
  0x45   : > { %s2879_s0 = scalar_lea.vmem %s3162_s29, 2048  ;;  %s2985_s15 = smov [#allocation6]  }
  0x46   : > { %p2880_p9 = scmp.ne.s32.totalorder %s3162_s29, %s2879_s0  ;;  %s2884_s8 = sshll.u32 %s2985_s15, 4  ;;  %s2885_s8 = int_to_ptr.vmem [resolvable:$false] %s2884_s8 }
  0x47   : > { %s2886_s28 = scalar_lea.vmem %s2885_s8, 4096  ;;  %p2887_p8 = scmp.lt.s32.totalorder %s3162_s29, %s2885_s8 }
  0x48   : > { %p2882_p1 = pnand %p2880_p9, %p2836_p3  ;;  %p2888_p2 = scmp.lt.s32.totalorder %s2886_s28, %s2879_s0 }
  0x4a   : > { %p2883_p6 = pneg %p2882_p1  ;;  %p2889_p5 = por %p2888_p2, %p2887_p8 }
  0x4c   : > { %p2890_p4 = pnand %p2889_p5, %p2883_p6 }
  0x4e   : > { %2893 = shalt.err (!%p2890_p4)
}
  0x4f   : > { %s2986_s20 = smov 128   ;;  %s2987_s30 = smov 8  }
  0x50   : > { %2651 = dma.hbm_to_vmem [thread:$0]  (!%p3115_p0), %s3160_s14, 2048, %s3162_s29, %s257_s18, %s2986_s20, %s2986_s20, %s2987_s30  }
  0x51   : > { %279 = sbr.rel (%p3153_p11) target bundleno = 1182 (0x49e), region = 44  ;;  %s3193_s7 = sand.u32 (!%p3153_p11), 1, %s2964_s22  }
  0x52   : > { %s2553_s16 = sshll.u32 (!%p3153_p11), %s3193_s7, 3  ;;  %s282_s19 = scalar_lea.sflag (!%p3153_p11), [#allocation4], %s3193_s7 }
  0x53   : > { %s3197_s0 = scalar_lea.vmem (!%p3153_p11), [#allocation3], %s2553_s16  ;;  %p4107_p8 = scmp.ne.s32.totalorder (!%p3153_p11), %s4100_s9, 0 }
  0x58   : > { %2947 = dma.done.wait (%p4107_p8), %s282_s19, 128  }
  0x59   : > { %2949 = vsyncadd (%p4107_p8), %s282_s19, 4294967168  ;;  %s2554_s29 = sshll.u32 %s3193_s7, 7  ;;  %s291_s13 = scalar_lea.sflag [#allocation7], %s3193_s7 }
  0x5a   : > { %s3205_s27 = scalar_lea.vmem [#allocation6], %s2554_s29 }
  0x5b   : > { %2951 = dma.done.wait (%p4107_p8), %s291_s13, 2048  }
  0x5c   : > { %2953 = vsyncadd (%p4107_p8), %s291_s13, 4294965248  ;;  %v2988_v0 = vmov 0.0   ;;  %vm2989_vm0 = vmmov 0   ;;  %v4095_v1 = vmov 0   ;;  %v2725_v2 = vld [vmem:[%s4087_s2] sm:$0xff]   ;;  %v2726_v3 = vld [vmem:[%s4087_s2 + $0x8] sm:$0xff]  }
  0x5d   : > { %2619 = vmatprep.subr.bf16.mxu1 %v2988_v0  ;;  %2635 = vmatprep.mubr.msk.bf16.mxu1 %vm2989_vm0, %v2988_v0  ;;  %v2727_v4 = vld [vmem:[%s4087_s2 + $0x10] sm:$0xff]   ;;  %v2728_v5 = vld [vmem:[%s4087_s2 + $0x18] sm:$0xff]   ;;  %v2737_v8 = vld [vmem:[%s3205_s27 + $0x14] ss:$8 sps:$4 sm:$0xff]   ;;  %s2991_s8 = smov 80   ;;  %s2992_s28 = smov 112  }
  0x5e   : > { %623 = vmatprep.mubr.bf16.mxu0 %v4095_v1  ;;  %2723 = vset.pattern.permute.xlu1 %v4095_v1  ;;  %v2734_v6 = vld [vmem:[%s3205_s27 + $0x4] ss:$8 sps:$4 sm:$0xff]   ;;  %v2736_v7 = vld [vmem:[%s3205_s27] ss:$8 sps:$4 sm:$0xff]   ;;  %v2739_v9 = vld [vmem:[%s3205_s27 + $0x10] ss:$8 sps:$4 sm:$0xff]  }
  0x5f   : > { %2724 = vset.pattern.permute.xlu0 %v4095_v1  ;;  %2620 = vmatpush3.bf16.msra.mxu1 %v2725_v2  ;;  %v2740_v10 = vld [vmem:[%s3205_s27 + $0x24] ss:$8 sps:$4 sm:$0xff]   ;;  %v2729_v11 = vld [vmem:[%s4087_s2 + $0x20] sm:$0xff]   ;;  %v2742_v12 = vld [vmem:[%s3205_s27 + $0x20] ss:$8 sps:$4 sm:$0xff]   ;;  %s2993_s20 = smov 64  }
  0x60   : > { %2621 = vmatprep.subr.bf16.mxu1 %v2988_v0  ;;  %591 = vmatprep.subr.bf16.mxu0 %v2734_v6  ;;  %v2743_v13 = vld [vmem:[%s3205_s27 + $0x34] ss:$8 sps:$4 sm:$0xff]   ;;  %v2745_v15 = vld [vmem:[%s3205_s27 + $0x30] ss:$8 sps:$4 sm:$0xff]   ;;  %v2746_v16 = vld [vmem:[%s3205_s27 + $0x44] ss:$8 sps:$4 sm:$0xff]  }
  0x61   : > { %592 = vmatpush1.bf16.msra.mxu0 %v2736_v7  ;;  %v2730_v14 = vld [vmem:[%s4087_s2 + $0x28] sm:$0xff]   ;;  %v2731_v17 = vld [vmem:[%s4087_s2 + $0x30] sm:$0xff]   ;;  %v2732_v20 = vld [vmem:[%s4087_s2 + $0x38] sm:$0xff]   ;;  %s2995_s30 = smov 32   ;;  %s2996_s16 = smov 48   ;;  %vm1216_vm1 = vcmask 130048  }
  0x62   : > { %593 = vmatprep.subr.bf16.mxu0 %v2737_v8  ;;  %v2748_v18 = vld [vmem:[%s3205_s27 + $0x40] ss:$8 sps:$4 sm:$0xff]   ;;  %v2749_v19 = vld [vmem:[%s3205_s27 + $0x54] ss:$8 sps:$4 sm:$0xff]   ;;  %v2751_v21 = vld [vmem:[%s3205_s27 + $0x50] ss:$8 sps:$4 sm:$0xff]  }
  0x63   : > { %2622 = vmatpush3.bf16.msra.mxu1 %v2726_v3  ;;  %v2733_v22 = vld [vmem:[%s3197_s0] sm:$0xff]   ;;  %v2752_v23 = vld [vmem:[%s3205_s27 + $0x64] ss:$8 sps:$4 sm:$0xff]   ;;  %v2754_v24 = vld [vmem:[%s3205_s27 + $0x60] ss:$8 sps:$4 sm:$0xff]   ;;  %s2997_s13 = smov 16  }
  0x64   : > { %2623 = vmatprep.subr.bf16.mxu1 %v2988_v0  ;;  %v2755_v25 = vld [vmem:[%s3205_s27 + $0x74] ss:$8 sps:$4 sm:$0xff]   ;;  %v2757_v26 = vld [vmem:[%s3205_s27 + $0x70] ss:$8 sps:$4 sm:$0xff]   ;;  %v2760_v29 = vld [vmem:[%s4089_s4 + $0x10] sm:$0xff]   ;;  %s2994_s27 = smov 96  }
  0x65   : > { %594 = vmatpush1.bf16.msra.mxu0 %v2739_v9  ;;  %v2758_v27 = vld [vmem:[%s4089_s4] sm:$0xff]   ;;  %v2759_v28 = vld [vmem:[%s4089_s4 + $0x8] sm:$0xff]   ;;  %v2761_v30 = vld [vmem:[%s4089_s4 + $0x18] sm:$0xff]   ;;  %s2555_s9 = sshll.u32 %s3193_s7, 8  ;;  %s2609_s15 = sshll.u32 %s2972_s24, 12 }
  0x66   : > { %595 = vmatprep.subr.bf16.mxu0 %v2740_v10  ;;  %v2762_v31 = vld [vmem:[%s4089_s4 + $0x20] sm:$0xff]   ;;  %v2763_v32 = vld [vmem:[%s4089_s4 + $0x28] sm:$0xff]   ;;  %v2764_v33 = vld [vmem:[%s4089_s4 + $0x30] sm:$0xff]   ;;  %s3910_s18 = scalar_lea.vmem [#allocation8], %s2555_s9  ;;  %p4109_p3 = scmp.ne.s32.totalorder %s4101_s10, 0 }
  0x67   : > { %2624 = vmatpush3.bf16.msra.mxu1 %v2727_v4  ;;  %v2765_v34 = vld [vmem:[%s4089_s4 + $0x38] sm:$0xff]   ;;  %v2580_v35 = vld [vmem:[%s4088_s3] ss:$0 sm:$0xff]  ;;  %v368_v50 = vld [vmem:[%s4090_s5 + $0x8] sm:$0xff]  ;;  %s2432_s0 = sshll.u32 %s3910_s18, 4  ;;  %s4027_s0 = int_to_ptr.vmem [resolvable:$true] %s2432_s0 }
  0x68   : > { %2625 = vmatprep.subr.bf16.mxu1 %v2988_v0  ;;  %v367_v47 = vld [vmem:[%s4090_s5] sm:$0xff]  ;;  %v369_v51 = vld [vmem:[%s4090_s5 + $0x10] sm:$0xff]  ;;  %v370_v55 = vld [vmem:[%s4090_s5 + $0x18] sm:$0xff] }
  0x69   : > { %596 = vmatpush1.bf16.msra.mxu0 %v2742_v12  ;;  %v371_v54 = vld [vmem:[%s4090_s5 + $0x20] sm:$0xff]  ;;  %v373_v58 = vld [vmem:[%s4090_s5 + $0x30] sm:$0xff]  ;;  %v372_v59 = vld [vmem:[%s4090_s5 + $0x28] sm:$0xff] }
  0x6a   : > { %597 = vmatprep.subr.bf16.mxu0 %v2743_v13  ;;  %v375_v62 = vld [vmem:[%s4090_s5 + $0x40] sm:$0xff]  ;;  %v374_v63 = vld [vmem:[%s4090_s5 + $0x38] sm:$0xff]  ;;  %v377_v3 = vld [vmem:[%s4090_s5 + $0x50] sm:$0xff] }
  0x6b   : > { %2626 = vmatpush3.bf16.msra.mxu1 %v2728_v5  ;;  %v376_v4 = vld [vmem:[%s4090_s5 + $0x48] sm:$0xff]  ;;  %v379_v7 = vld [vmem:[%s4090_s5 + $0x60] sm:$0xff]  ;;  %v378_v8 = vld [vmem:[%s4090_s5 + $0x58] sm:$0xff] }
  0x6c   : > { %2627 = vmatprep.subr.bf16.mxu1 %v2988_v0  ;;  %v380_v12 = vld [vmem:[%s4090_s5 + $0x68] sm:$0xff] }
  0x6d   : > { %598 = vmatpush1.bf16.msra.mxu0 %v2745_v15  ;;  %v382_v15 = vld [vmem:[%s4090_s5 + $0x78] sm:$0xff] }
  0x6e   : > { %599 = vmatprep.subr.bf16.mxu0 %v2746_v16 }
  0x6f   : > { %2628 = vmatpush3.bf16.msra.mxu1 %v2729_v11  ;;  %v381_v11 = vld [vmem:[%s4090_s5 + $0x70] sm:$0xff] }
  0x70   : > { %2629 = vmatprep.subr.bf16.mxu1 %v2988_v0 }
  0x71   : > { %600 = vmatpush1.bf16.msra.mxu0 %v2748_v18 }
  0x72   : > { %601 = vmatprep.subr.bf16.mxu0 %v2749_v19 }
  0x73   : > { %2630 = vmatpush3.bf16.msra.mxu1 %v2730_v14 }
  0x74   : > { %2631 = vmatprep.subr.bf16.mxu1 %v2988_v0 }
  0x75   : > { %602 = vmatpush1.bf16.msra.mxu0 %v2751_v21 }
  0x76   : > { %603 = vmatprep.subr.bf16.mxu0 %v2752_v23 }
  0x77   : > { %2632 = vmatpush3.bf16.msra.mxu1 %v2731_v17 }
  0x78   : > { %2633 = vmatprep.subr.bf16.mxu1 %v2988_v0 }
  0x79   : > { %604 = vmatpush1.bf16.msra.mxu0 %v2754_v24 }
  0x7a   : > { %605 = vmatprep.subr.bf16.mxu0 %v2755_v25 }
  0x7b   : > { %2634 = vmatpush3.bf16.msra.mxu1 %v2732_v20 }
  0x7d   : > { %606 = vmatpush1.bf16.msra.mxu0 %v2757_v26 }
  0x7e   : > { %2636 = vmatmul.mubr.bf16.vlgmr.msra.gmra.mrb[0].mxu1 %v2733_v22 }
  0x7f   : > { %1252 = vmatprep.mubr.bf16.mxu1 %v4095_v1 }
  0x80   : > { %624 = vmatmul.mubr.bf16.vlgmr.msra.gmra.mrb[0].mxu0 %v2758_v27 }
  0x81   : > { %633 = vmatprep.mubr.bf16.mxu0 %v4095_v1 }
  0x88   : > { %634 = vmatmul.mubr.bf16.gmra.mrb[4].mxu0 %v2759_v28 }
  0x89   : > { %643 = vmatprep.mubr.bf16.mxu0 %v4095_v1 }
  0x90   : > { %644 = vmatmul.mubr.bf16.gmra.mrb[8].mxu0 %v2760_v29 }
  0x91   : > { %653 = vmatprep.mubr.bf16.mxu0 %v4095_v1 }
  0x98   : > { %654 = vmatmul.mubr.bf16.gmra.mrb[12].mxu0 %v2761_v30 }
  0x99   : > { %663 = vmatprep.mubr.bf16.mxu0 %v4095_v1 }
  0xa0   : > { %664 = vmatmul.mubr.bf16.gmra.mrb[16].mxu0 %v2762_v31  ;;  %v2998_v31 = vmov 1983009808  }
  0xa1   : > { %673 = vmatprep.mubr.bf16.mxu0 %v4095_v1 }
  0xa8   : > { %674 = vmatmul.mubr.bf16.gmra.mrb[20].mxu0 %v2763_v32  ;;  %v907_v32 = vunpack.c.l.s4 %v2998_v31 }
  0xa9   : > { %683 = vmatprep.mubr.bf16.mxu0 %v4095_v1 }
  0xb0   : > { %684 = vmatmul.mubr.bf16.gmra.mrb[24].mxu0 %v2764_v33  ;;  %v909_v33 = vlaneseq }
  0xb1   : > { %693 = vmatprep.mubr.bf16.mxu0 %v4095_v1 }
  0xb8   : > { %694 = vmatmul.mubr.bf16.gmra.mrb[28].mxu0 %v2765_v34 }
  0xb9   : > { %1574 = vmatprep.mubr.bf16.mxu0 %v4095_v1 }
 0x151   : > { %v849_v36 = vpop.f32.mrb[0].mxu1 }
 0x152   : > { %v2637_v37 = vpop.f32.mrb[1].mxu1  ;;  %v850_v39 = vadd.f32 %v2580_v35, %v849_v36 }
 0x153   : > { %v852_v38 = vpop.f32.mrb[2].mxu1  ;;  %v3295_v43 = vpop.f32.mrb[0].mxu0  ;;  %v908_v37 = vunpack.c.0.s8 %v907_v32 }
 0x154   : > { %v853_v40 = vadd.f32 %v2580_v35, %v852_v38  ;;  %v2638_v41 = vpop.f32.mrb[3].mxu1  ;;  %v3299_v44 = vpop.f32.mrb[1].mxu0  ;;  %v2999_v35 = vmov 1934713408   ;;  %v910_v38 = vshrl.u32 %v909_v33, 7 }
 0x155   : > { %v3301_v45 = vpop.f32.mrb[2].mxu0  ;;  %v939_v36 = vunpack.c.l.s4 %v2999_v35 }
 0x156   : > { %v3291_v42 = vpack.c.bf16 %v853_v40, %v850_v39  ;;  %v3303_v46 = vpop.f32.mrb[3].mxu0 }
 0x158   : > { %862 = vrot.lane.b32.xlu1 %v3291_v42, %s2991_s8  ;;  %858 = vrot.lane.b32.xlu0 %v3291_v42, %s2992_s28  ;;  %s4025_s28 = scalar_lea.hbm %s4091_s6, %s2609_s15 }
 0x15b   : > { %v3310_v48 = vpop.f32.mrb[4].mxu0 }
 0x15c   : > { %864 = vrot.lane.b32.xlu1 %v3291_v42, %s2993_s20  ;;  %860 = vrot.lane.b32.xlu0 %v3291_v42, %s2994_s27  ;;  %v3314_v49 = vpop.f32.mrb[5].mxu0  ;;  %s2416_s20 = scalar_lea.sflag [#allocation5], %s3193_s7  ;;  %s2894_s27 = scalar_lea.vmem %s4027_s0, 4096 }
 0x15d   : > { %v3322_v52 = vpop.f32.mrb[6].mxu0  ;;  %p2895_p0 = scmp.ne.s32.totalorder %s4027_s0, %s2894_s27 }
 0x15e   : > { %v3324_v53 = vpop.f32.mrb[7].mxu0 }
 0x15f   : > { %p2896_p11 = pnand %p2895_p0, %p4109_p3 }
 0x160   : > { %868 = vrot.lane.b32.xlu1 %v3291_v42, %s2995_s30  ;;  %866 = vrot.lane.b32.xlu0 %v3291_v42, %s2996_s16  ;;  %s3000_s30 = smov [#allocation8]  }
 0x161   : > { %p2897_p13 = pneg %p2896_p11  ;;  %s2898_s16 = sshll.u32 %s3000_s30, 4  ;;  %s2899_s16 = int_to_ptr.vmem [resolvable:$false] %s2898_s16 }
 0x162   : > { %s2900_s19 = scalar_lea.vmem %s2899_s16, 8192  ;;  %p2901_p7 = scmp.lt.s32.totalorder %s4027_s0, %s2899_s16 }
 0x163   : > { %v3332_v56 = vpop.f32.mrb[8].mxu0  ;;  %p2902_p10 = scmp.lt.s32.totalorder %s2900_s19, %s2894_s27 }
 0x164   : > { %870 = vrot.lane.b32.xlu0 %v3291_v42, %s2997_s13  ;;  %385 = vperm.xlu1 %2723, %v367_v47   ;;  %v3334_v57 = vpop.f32.mrb[9].mxu0 }
 0x165   : > { %v3342_v60 = vpop.f32.mrb[10].mxu0  ;;  %p2903_p12 = por %p2902_p10, %p2901_p7 }
 0x166   : > { %v3344_v61 = vpop.f32.mrb[11].mxu0 }
 0x167   : > { %p2904_p9 = pnand %p2903_p12, %p2897_p13 }
 0x168   : > { %390 = vperm.xlu0 %2724, %v368_v50   ;;  %395 = vperm.xlu1 %2723, %v369_v51  }
 0x16b   : > { %v3352_v0 = vpop.f32.mrb[12].mxu0 }
 0x16c   : > { %405 = vperm.xlu0 %2724, %v371_v54   ;;  %400 = vperm.xlu1 %2723, %v370_v55   ;;  %v3354_v2 = vpop.f32.mrb[13].mxu0  ;;  %v940_v55 = vunpack.c.0.s8 %v939_v36 }
 0x16d   : > { %v3362_v5 = vpop.f32.mrb[14].mxu0 }
 0x16e   : > { %v3364_v6 = vpop.f32.mrb[15].mxu0  ;;  %v3417_v33 = vsub.s32 %v940_v55, %v910_v38 }
 0x170   : > { %415 = vperm.xlu0 %2724, %v373_v58   ;;  %410 = vperm.xlu1 %2723, %v372_v59   ;;  %v876_v58 = vshrl.u32 %v3291_v42, 16 }
 0x173   : > { %v3372_v9 = vpop.f32.mrb[16].mxu0 }
 0x174   : > { %425 = vperm.xlu0 %2724, %v375_v62   ;;  %420 = vperm.xlu1 %2723, %v374_v63   ;;  %v3374_v10 = vpop.f32.mrb[17].mxu0  ;;  %v3415_v62 = vsub.s32 %v908_v37, %v910_v38 }
 0x175   : > { %v3382_v13 = vpop.f32.mrb[18].mxu0 }
 0x176   : > { %v3384_v14 = vpop.f32.mrb[19].mxu0 }
 0x178   : > { %435 = vperm.xlu0 %2724, %v377_v3   ;;  %430 = vperm.xlu1 %2723, %v376_v4  }
 0x17b   : > { %v3389_v16 = vpop.f32.mrb[20].mxu0 }
 0x17c   : > { %445 = vperm.xlu0 %2724, %v379_v7   ;;  %440 = vperm.xlu1 %2723, %v378_v8   ;;  %v3391_v17 = vpop.f32.mrb[21].mxu0 }
 0x17d   : > { %v3393_v18 = vpop.f32.mrb[22].mxu0 }
 0x17e   : > { %v3395_v19 = vpop.f32.mrb[23].mxu0 }
 0x180   : > { %455 = vperm.xlu0 %2724, %v381_v11   ;;  %450 = vperm.xlu1 %2723, %v380_v12  }
 0x183   : > { %v3397_v20 = vpop.f32.mrb[24].mxu0 }
 0x184   : > { %460 = vperm.xlu1 %2723, %v382_v15   ;;  %v3399_v21 = vpop.f32.mrb[25].mxu0 }
 0x185   : > { %v3401_v22 = vpop.f32.mrb[26].mxu0 }
 0x186   : > { %v3403_v23 = vpop.f32.mrb[27].mxu0 }
 0x18b   : > { %v3405_v24 = vpop.f32.mrb[28].mxu0 }
 0x18c   : > { %v3407_v25 = vpop.f32.mrb[29].mxu0 }
 0x18d   : > { %v3409_v26 = vpop.f32.mrb[30].mxu0 }
 0x18e   : > { %v3411_v27 = vpop.f32.mrb[31].mxu0 }
 0x1ca   : > { %v863_v28 = vpop.permute.xlu1 %862  ;;  %v859_v29 = vpop.permute.xlu0 %858 }
 0x1cb   : > { %v874_v47 = vpack.i.b16 %v859_v29, %v3291_v42  ;;  %v877_v50 = vshrl.u32 %v859_v29, 16  ;;  %v885_v3 = vshrl.u32 %v863_v28, 16 }
 0x1cd   : > { %v878_v32 = vpack.i.b16 %v877_v50, %v876_v58 }
 0x1ce   : > { %v861_v30 = vpop.permute.xlu0 %860  ;;  %v865_v34 = vpop.permute.xlu1 %864 }
 0x1cf   : > { %v892_v51 = vshrl.u32 %v865_v34, 16  ;;  %v884_v59 = vshrl.u32 %v861_v30, 16  ;;  %v882_v11 = vpack.i.b16 %v863_v28, %v861_v30 }
 0x1d1   : > { %v886_v29 = vpack.i.b16 %v885_v3, %v884_v59 }
 0x1d2   : > { %v867_v39 = vpop.permute.xlu0 %866  ;;  %v869_v54 = vpop.permute.xlu1 %868 }
 0x1d3   : > { %v890_v40 = vpack.i.b16 %v867_v39, %v865_v34  ;;  %v893_v41 = vshrl.u32 %v867_v39, 16  ;;  %v900_v12 = vshrl.u32 %v869_v54, 16 }
 0x1d5   : > { %v894_v4 = vpack.i.b16 %v893_v41, %v892_v51  ;;  %v904_v7 = vcombine.low %v874_v47, %v890_v40  ;;  %v905_v8 = vcombine.high %v874_v47, %v890_v40 }
 0x1d6   : > { %v871_v63 = vpop.permute.xlu0 %870 }
 0x1d7   : > { %v898_v15 = vpack.i.b16 %v871_v63, %v869_v54  ;;  %v901_v31 = vshrl.u32 %v871_v63, 16  ;;  %v912_v42 = vrot.slane %v904_v7, %v3415_v62  ;;  %v919_v37 = vrot.slane %v905_v8, %v3415_v62 }
 0x1d8   : > { %v972_v39 = vcombine.low %v878_v32, %v894_v4  ;;  %v973_v1 = vcombine.high %v878_v32, %v894_v4 }
 0x1d9   : > { %v902_v34 = vpack.i.b16 %v901_v31, %v900_v12  ;;  %v920_v35 = vcombine.low %v882_v11, %v898_v15  ;;  %v921_v36 = vcombine.high %v882_v11, %v898_v15 }
 0x1da   : > { %v980_v54 = vrot.slane %v972_v39, %v3415_v62  ;;  %v987_v55 = vrot.slane %v973_v1, %v3415_v62 }
 0x1db   : > { %v928_v41 = vrot.slane %v920_v35, %v3415_v62  ;;  %v935_v28 = vrot.slane %v921_v36, %v3415_v62  ;;  %v988_v30 = vcombine.low %v886_v29, %v902_v34  ;;  %v989_v40 = vcombine.high %v886_v29, %v902_v34 }
 0x1dd   : > { %v936_v47 = vcombine.low %v912_v42, %v928_v41  ;;  %v937_v50 = vcombine.high %v912_v42, %v928_v41  ;;  %v952_v38 = vcombine.low %v919_v37, %v935_v28  ;;  %v953_v51 = vcombine.high %v919_v37, %v935_v28 }
 0x1de   : > { %v996_v58 = vrot.slane %v988_v30, %v3415_v62  ;;  %v1003_v59 = vrot.slane %v989_v40, %v3415_v62 }
 0x1df   : > { %v944_v63 = vrot.slane %v936_v47, %v3417_v33  ;;  %v951_v3 = vrot.slane %v937_v50, %v3417_v33  ;;  %v960_v4 = vrot.slane %v952_v38, %v3417_v33  ;;  %v967_v7 = vrot.slane %v953_v51, %v3417_v33 }
 0x1e0   : > { %v1004_v8 = vcombine.low %v980_v54, %v996_v58  ;;  %v1005_v11 = vcombine.high %v980_v54, %v996_v58  ;;  %v1020_v12 = vcombine.low %v987_v55, %v1003_v59  ;;  %v1021_v15 = vcombine.high %v987_v55, %v1003_v59 }
 0x1e1   : > { %v1040_v31 = vcombine.low %v944_v63, %v951_v3  ;;  %v2590_v32 = vcombine.high %v944_v63, %v951_v3  ;;  %v1056_v29 = vcombine.low %v960_v4, %v967_v7  ;;  %v2591_v1 = vcombine.high %v960_v4, %v967_v7 }
 0x1e2   : > { %v1012_v34 = vrot.slane %v1004_v8, %v3417_v33  ;;  %v1019_v35 = vrot.slane %v1005_v11, %v3417_v33  ;;  %v1028_v36 = vrot.slane %v1020_v12, %v3417_v33  ;;  %v1035_v42 = vrot.slane %v1021_v15, %v3417_v33 }
 0x1e3   : > { %v386_v37 = vpop.permute.xlu1 %385  ;;  %v3436_v39 = vrot.slane %v1040_v31, %v3415_v62  ;;  %v3439_v41 = vrot.slane %v2590_v32, %v3415_v62  ;;  %v3442_v28 = vrot.slane %v1056_v29, %v3415_v62  ;;  %v3445_v30 = vrot.slane %v2591_v1, %v3415_v62 }
 0x1e4   : > { %v1108_v40 = vcombine.low %v1012_v34, %v1019_v35  ;;  %v2592_v47 = vcombine.high %v1012_v34, %v1019_v35  ;;  %v1124_v50 = vcombine.low %v1028_v36, %v1035_v42  ;;  %v2593_v38 = vcombine.high %v1028_v36, %v1035_v42 }
 0x1e5   : > { %v1072_v3 = vcombine.low %v3436_v39, %v3439_v41  ;;  %v1088_v4 = vcombine.low %v3442_v28, %v3445_v30  ;;  %v626_v8 = vadd.f32 %v3295_v43, %v386_v37  ;;  %v628_v12 = vadd.f32 %v3299_v44, %v386_v37 }
 0x1e6   : > { %v3448_v51 = vrot.slane %v1108_v40, %v3415_v62  ;;  %v3451_v54 = vrot.slane %v2592_v47, %v3415_v62  ;;  %v3454_v55 = vrot.slane %v1124_v50, %v3415_v62  ;;  %v3457_v58 = vrot.slane %v2593_v38, %v3415_v62 }
 0x1e7   : > { %v391_v59 = vpop.permute.xlu0 %390  ;;  %v396_v63 = vpop.permute.xlu1 %395  ;;  %v3474_v42 = vrot.slane %v1072_v3, %v3417_v33  ;;  %v3479_v44 = vrot.slane %v1088_v4, %v3417_v33 }
 0x1e8   : > { %v1140_v7 = vcombine.low %v3448_v51, %v3451_v54  ;;  %v1156_v11 = vcombine.low %v3454_v55, %v3457_v58  ;;  %v630_v15 = vadd.f32 %v3301_v45, %v391_v59  ;;  %v632_v31 = vadd.f32 %v3303_v46, %v391_v59 }
 0x1e9   : > { %v636_v32 = vadd.f32 %v3310_v48, %v396_v63  ;;  %v638_v36 = vadd.f32 %v3314_v49, %v396_v63  ;;  %v1104_v59 = vcombine.low %v3474_v42, %v3479_v44 }
 0x1ea   : > { %v704_v34 = vpack.c.bf16 %v630_v15, %v626_v8  ;;  %v705_v35 = vpack.c.bf16 %v632_v31, %v628_v12  ;;  %v3482_v45 = vrot.slane %v1140_v7, %v3417_v33  ;;  %v1164_v46 = vrot.slane %v1156_v11, %v3417_v33 }
 0x1eb   : > { %v406_v29 = vpop.permute.xlu0 %405  ;;  %v401_v1 = vpop.permute.xlu1 %400  ;;  %v4108_v31 = vmov 0  }
 0x1ec   : > { %v640_v43 = vadd.f32 %v3322_v52, %v401_v1  ;;  %v642_v40 = vadd.f32 %v3324_v53, %v401_v1  ;;  %1220 = vmatprep.subr.bf16.mxu1 %v705_v35  ;;  %v646_v50 = vadd.f32 %v3332_v56, %v406_v29  ;;  %v648_v52 = vadd.f32 %v3334_v57, %v406_v29 }
 0x1ed   : > { %1221 = vmatpush1.bf16.msra.mxu1 %v704_v34  ;;  %v1172_v63 = vcombine.low %v3482_v45, %v1164_v46  ;;  %v1179_v35 = vshrl.u32 %v1104_v59, 16 }
 0x1ee   : > { %v706_v48 = vpack.c.bf16 %v640_v43, %v636_v32  ;;  %v707_v37 = vpack.c.bf16 %v642_v40, %v638_v36  ;;  %v1157_v36 = vcombine.high %v3454_v55, %v3457_v58 }
 0x1ef   : > { %v416_v49 = vpop.permute.xlu0 %415  ;;  %v411_v47 = vpop.permute.xlu1 %410  ;;  %v1178_v7 = vpack.i.b16 %v1172_v63, %v1104_v59  ;;  %v1180_v1 = vshrl.u32 %v1172_v63, 16 }
 0x1f0   : > { %v650_v53 = vadd.f32 %v3342_v60, %v411_v47  ;;  %v652_v38 = vadd.f32 %v3344_v61, %v411_v47  ;;  %1266 = vmatprep.subr.bf16.mxu1 %v707_v37  ;;  %v656_v56 = vadd.f32 %v3352_v0, %v416_v49  ;;  %v658_v57 = vadd.f32 %v3354_v2, %v416_v49 }
 0x1f1   : > { %2594 = vmatmul.mubr.msk.bf16.vlgmr.msra.gmra.mrb[4].mxu1 %vm1216_vm1, %v1178_v7 }
 0x1f2   : > { %v708_v3 = vpack.c.bf16 %v650_v53, %v646_v50  ;;  %v709_v4 = vpack.c.bf16 %v652_v38, %v648_v52  ;;  %1267 = vmatpush1.bf16.msra.mxu1 %v706_v48  ;;  %1298 = vmatprep.mubr.bf16.mxu1 %v4108_v31  ;;  %v1073_v48 = vcombine.high %v3436_v39, %v3439_v41 }
 0x1f3   : > { %v426_v8 = vpop.permute.xlu0 %425  ;;  %v421_v11 = vpop.permute.xlu1 %420  ;;  %v1171_v39 = vrot.slane %v1157_v36, %v3417_v33  ;;  %v1105_v53 = vcombine.high %v3474_v42, %v3479_v44 }
 0x1f4   : > { %v660_v60 = vadd.f32 %v3362_v5, %v421_v11  ;;  %v662_v61 = vadd.f32 %v3364_v6, %v421_v11  ;;  %1312 = vmatprep.subr.bf16.mxu1 %v709_v4  ;;  %v666_v34 = vadd.f32 %v3372_v9, %v426_v8  ;;  %v668_v0 = vadd.f32 %v3374_v10, %v426_v8 }
 0x1f5   : > { %v1141_v6 = vcombine.high %v3448_v51, %v3451_v54  ;;  %v1089_v9 = vcombine.high %v3442_v28, %v3445_v30  ;;  %v1181_v10 = vpack.i.b16 %v1180_v1, %v1179_v35  ;;  %v1087_v30 = vrot.slane %v1073_v48, %v3417_v33 }
 0x1f6   : > { %v710_v12 = vpack.c.bf16 %v660_v60, %v656_v56  ;;  %v711_v15 = vpack.c.bf16 %v662_v61, %v658_v57  ;;  %v1185_v11 = vshrl.u32 %v1105_v53, 16 }
 0x1f7   : > { %v436_v32 = vpop.permute.xlu0 %435  ;;  %v431_v29 = vpop.permute.xlu1 %430  ;;  %v1155_v55 = vrot.slane %v1141_v6, %v3417_v33 }
 0x1f8   : > { %v670_v2 = vadd.f32 %v3382_v13, %v431_v29  ;;  %v672_v5 = vadd.f32 %v3384_v14, %v431_v29  ;;  %v676_v14 = vadd.f32 %v3389_v16, %v436_v32  ;;  %v678_v49 = vadd.f32 %v3391_v17, %v436_v32 }
 0x1f9   : > { %2595 = vmatmul.mubr.msk.bf16.vlgmr.msra.gmra.mrb[8].mxu1 %vm1216_vm1, %v1181_v10  ;;  %v1103_v16 = vrot.slane %v1089_v9, %v3417_v33  ;;  %v1175_v63 = vcombine.high %v1155_v55, %v1171_v39 }
 0x1fa   : > { %v712_v43 = vpack.c.bf16 %v670_v2, %v666_v34  ;;  %v713_v40 = vpack.c.bf16 %v672_v5, %v668_v0  ;;  %1313 = vmatpush1.bf16.msra.mxu1 %v708_v3  ;;  %1344 = vmatprep.mubr.bf16.mxu1 %v4108_v31 }
 0x1fb   : > { %v446_v37 = vpop.permute.xlu0 %445  ;;  %v441_v13 = vpop.permute.xlu1 %440  ;;  %1358 = vmatprep.subr.bf16.mxu1 %v711_v15  ;;  %v1107_v3 = vcombine.high %v1087_v30, %v1103_v16  ;;  %v1198_v42 = vshrl.u32 %v1175_v63, 16 }
 0x1fc   : > { %v680_v51 = vadd.f32 %v3393_v18, %v441_v13  ;;  %v682_v54 = vadd.f32 %v3395_v19, %v441_v13  ;;  %v1173_v18 = vcombine.high %v3482_v45, %v1164_v46  ;;  %v686_v19 = vadd.f32 %v3397_v20, %v446_v37 }
 0x1fd   : > { %v688_v58 = vadd.f32 %v3399_v21, %v446_v37  ;;  %v1197_v8 = vshrl.u32 %v1107_v3, 16 }
 0x1fe   : > { %v714_v41 = vpack.c.bf16 %v680_v51, %v676_v14  ;;  %v715_v28 = vpack.c.bf16 %v682_v54, %v678_v49  ;;  %v1184_v4 = vpack.i.b16 %v1173_v18, %v1105_v53  ;;  %v1186_v44 = vshrl.u32 %v1173_v18, 16 }
 0x1ff   : > { %v451_v17 = vpop.permute.xlu1 %450  ;;  %v456_v52 = vpop.permute.xlu0 %455 }
 0x200   : > { %v690_v47 = vadd.f32 %v3401_v22, %v451_v17  ;;  %v692_v50 = vadd.f32 %v3403_v23, %v451_v17  ;;  %v696_v45 = vadd.f32 %v3405_v24, %v456_v52  ;;  %v698_v20 = vadd.f32 %v3407_v25, %v456_v52 }
 0x201   : > { %2596 = vmatmul.mubr.msk.bf16.vlgmr.msra.gmra.mrb[12].mxu1 %vm1216_vm1, %v1184_v4  ;;  %v1199_v24 = vpack.i.b16 %v1198_v42, %v1197_v8  ;;  %v1187_v25 = vpack.i.b16 %v1186_v44, %v1185_v11 }
 0x202   : > { %v716_v38 = vpack.c.bf16 %v690_v47, %v686_v19  ;;  %v717_v59 = vpack.c.bf16 %v692_v50, %v688_v58  ;;  %1359 = vmatpush1.bf16.msra.mxu1 %v710_v12  ;;  %1390 = vmatprep.mubr.bf16.mxu1 %v4108_v31  ;;  %v1196_v12 = vpack.i.b16 %v1175_v63, %v1107_v3 }
 0x203   : > { %v461_v7 = vpop.permute.xlu1 %460  ;;  %1404 = vmatprep.subr.bf16.mxu1 %v713_v40 }
 0x204   : > { %v700_v21 = vadd.f32 %v3409_v26, %v461_v7  ;;  %v702_v22 = vadd.f32 %v3411_v27, %v461_v7  ;;  %v1174_v26 = vcombine.low %v1155_v55, %v1171_v39  ;;  %v1106_v27 = vcombine.low %v1087_v30, %v1103_v16 }
 0x206   : > { %v718_v23 = vpack.c.bf16 %v700_v21, %v696_v45  ;;  %v719_v46 = vpack.c.bf16 %v702_v22, %v698_v20  ;;  %v1190_v56 = vpack.i.b16 %v1174_v26, %v1106_v27  ;;  %v1192_v57 = vshrl.u32 %v1174_v26, 16 }
 0x207   : > { %v1191_v60 = vshrl.u32 %v1106_v27, 16 }
 0x208   : > { %1542 = vmatprep.subr.bf16.mxu0 %v719_v46 }
 0x209   : > { %1543 = vmatpush1.bf16.msra.mxu0 %v718_v23  ;;  %2597 = vmatmul.mubr.msk.bf16.vlgmr.msra.gmra.mrb[16].mxu1 %vm1216_vm1, %v1187_v25  ;;  %v1193_v61 = vpack.i.b16 %v1192_v57, %v1191_v60 }
 0x20a   : > { %1405 = vmatpush1.bf16.msra.mxu1 %v712_v43  ;;  %1436 = vmatprep.mubr.bf16.mxu1 %v4108_v31 }
 0x20b   : > { %1450 = vmatprep.subr.bf16.mxu1 %v715_v28 }
 0x20c   : > { %2601 = vmatmul.mubr.msk.bf16.vlgmr.msra.gmra.mrb[32].mxu0 %vm1216_vm1, %v1199_v24 }
 0x211   : > { %2598 = vmatmul.mubr.msk.bf16.vlgmr.msra.gmra.mrb[20].mxu1 %vm1216_vm1, %v1190_v56 }
 0x212   : > { %1451 = vmatpush1.bf16.msra.mxu1 %v714_v41  ;;  %1482 = vmatprep.mubr.bf16.mxu1 %v4108_v31 }
 0x213   : > { %1496 = vmatprep.subr.bf16.mxu1 %v717_v59 }
 0x219   : > { %2599 = vmatmul.mubr.msk.bf16.vlgmr.msra.gmra.mrb[24].mxu1 %vm1216_vm1, %v1193_v61 }
 0x21a   : > { %1497 = vmatpush1.bf16.msra.mxu1 %v716_v38  ;;  %1528 = vmatprep.mubr.bf16.mxu1 %v4108_v31 }
 0x221   : > { %2600 = vmatmul.mubr.msk.bf16.vlgmr.msra.gmra.mrb[28].mxu1 %vm1216_vm1, %v1196_v12 }
 0x2c4   : > { %v3541_v15 = vpop.f32.mrb[4].mxu1 }
 0x2c5   : > { %v3543_v32 = vpop.f32.mrb[5].mxu1 }
 0x2c6   : > { %v3545_v29 = vpop.f32.mrb[6].mxu1  ;;  %v1585_v1 = vmax.f32 %v3541_v15, %v3543_v32 }
 0x2c7   : > { %v3549_v34 = vpop.f32.mrb[7].mxu1 }
 0x2c8   : > { %1586 = vmax.xlane.f32.xlu0 %v1585_v1  ;;  %v1588_v0 = vmax.f32 %v3545_v29, %v3549_v34 }
 0x2ca   : > { %1589 = vmax.xlane.f32.xlu1 %v1588_v0 }
 0x2cc   : > { %v3553_v31 = vpop.f32.mrb[8].mxu1 }
 0x2cd   : > { %v3555_v2 = vpop.f32.mrb[9].mxu1 }
 0x2ce   : > { %v3557_v5 = vpop.f32.mrb[10].mxu1  ;;  %v1591_v6 = vmax.f32 %v3553_v31, %v3555_v2 }
 0x2cf   : > { %v3561_v35 = vpop.f32.mrb[11].mxu1 }
 0x2d0   : > { %1592 = vmax.xlane.f32.xlu0 %v1591_v6  ;;  %v1594_v36 = vmax.f32 %v3557_v5, %v3561_v35 }
 0x2d4   : > { %1595 = vmax.xlane.f32.xlu0 %v1594_v36  ;;  %v3565_v43 = vpop.f32.mrb[12].mxu1 }
 0x2d5   : > { %v3567_v40 = vpop.f32.mrb[13].mxu1 }
 0x2d6   : > { %v3569_v48 = vpop.f32.mrb[14].mxu1  ;;  %v1597_v9 = vmax.f32 %v3565_v43, %v3567_v40 }
 0x2d7   : > { %v3573_v10 = vpop.f32.mrb[15].mxu1 }
 0x2d8   : > { %1598 = vmax.xlane.f32.xlu1 %v1597_v9  ;;  %v1600_v37 = vmax.f32 %v3569_v48, %v3573_v10 }
 0x2da   : > { %1601 = vmax.xlane.f32.xlu0 %v1600_v37 }
 0x2dc   : > { %v3579_v14 = vpop.f32.mrb[16].mxu1 }
 0x2dd   : > { %v3583_v51 = vpop.f32.mrb[17].mxu1 }
 0x2de   : > { %v3589_v39 = vpop.f32.mrb[18].mxu1  ;;  %v1603_v41 = vmax.f32 %v3579_v14, %v3583_v51 }
 0x2df   : > { %v3577_v13 = vpop.f32.mrb[32].mxu0  ;;  %v3595_v30 = vpop.f32.mrb[19].mxu1 }
 0x2e0   : > { %v3581_v49 = vpop.f32.mrb[33].mxu0  ;;  %1604 = vmax.xlane.f32.xlu1 %v1603_v41  ;;  %v1606_v17 = vmax.f32 %v3589_v39, %v3595_v30 }
 0x2e1   : > { %v3585_v54 = vpop.f32.mrb[34].mxu0  ;;  %v1627_v55 = vmax.f32 %v3577_v13, %v3581_v49 }
 0x2e2   : > { %v3593_v28 = vpop.f32.mrb[35].mxu0  ;;  %1607 = vmax.xlane.f32.xlu0 %v1606_v17 }
 0x2e3   : > { %v1630_v16 = vmax.f32 %v3585_v54, %v3593_v28 }
 0x2e4   : > { %v3601_v18 = vpop.f32.mrb[20].mxu1 }
 0x2e5   : > { %v3603_v19 = vpop.f32.mrb[21].mxu1 }
 0x2e6   : > { %v3605_v58 = vpop.f32.mrb[22].mxu1  ;;  %v1609_v47 = vmax.f32 %v3601_v18, %v3603_v19 }
 0x2e7   : > { %v3609_v50 = vpop.f32.mrb[23].mxu1 }
 0x2e8   : > { %1610 = vmax.xlane.f32.xlu1 %v1609_v47  ;;  %v1612_v52 = vmax.f32 %v3605_v58, %v3609_v50 }
 0x2ea   : > { %1613 = vmax.xlane.f32.xlu0 %v1612_v52 }
 0x2ec   : > { %v3613_v53 = vpop.f32.mrb[24].mxu1 }
 0x2ed   : > { %v3615_v38 = vpop.f32.mrb[25].mxu1 }
 0x2ee   : > { %v3617_v59 = vpop.f32.mrb[26].mxu1  ;;  %v1615_v63 = vmax.f32 %v3613_v53, %v3615_v38 }
 0x2ef   : > { %v3621_v3 = vpop.f32.mrb[27].mxu1 }
 0x2f0   : > { %1616 = vmax.xlane.f32.xlu1 %v1615_v63  ;;  %v1618_v4 = vmax.f32 %v3617_v59, %v3621_v3 }
 0x2f2   : > { %1619 = vmax.xlane.f32.xlu0 %v1618_v4 }
 0x2f4   : > { %v3625_v7 = vpop.f32.mrb[28].mxu1 }
 0x2f5   : > { %v3627_v45 = vpop.f32.mrb[29].mxu1 }
 0x2f6   : > { %v3629_v20 = vpop.f32.mrb[30].mxu1  ;;  %v1621_v21 = vmax.f32 %v3625_v7, %v3627_v45 }
 0x2f7   : > { %v3633_v22 = vpop.f32.mrb[31].mxu1 }
 0x2f8   : > { %v1624_v23 = vmax.f32 %v3629_v20, %v3633_v22  ;;  %1622 = vmax.xlane.f32.xlu1 %v1621_v21 }
 0x2fa   : > { %1625 = vmax.xlane.f32.xlu0 %v1624_v23 }
 0x2fc   : > { %1628 = vmax.xlane.f32.xlu1 %v1627_v55 }
 0x2fe   : > { %1631 = vmax.xlane.f32.xlu0 %v1630_v16 }
 0x355   : > { %v1587_v46 = vpop.xlane.xlu0 %1586 }
 0x357   : > { %v1590_v44 = vpop.xlane.xlu1 %1589 }
 0x35d   : > { %v1593_v42 = vpop.xlane.xlu0 %1592 }
 0x361   : > { %v1596_v8 = vpop.xlane.xlu0 %1595 }
 0x365   : > { %v1599_v11 = vpop.xlane.xlu1 %1598 }
 0x366   : > { %v1633_v12 = vmax.f32 %v1587_v46, %v1599_v11 }
 0x367   : > { %v1602_v24 = vpop.xlane.xlu0 %1601 }
 0x368   : > { %v1640_v6 = vmax.f32 %v1590_v44, %v1602_v24 }
 0x36d   : > { %v1605_v25 = vpop.xlane.xlu1 %1604 }
 0x36e   : > { %v1634_v1 = vmax.f32 %v1593_v42, %v1605_v25 }
 0x36f   : > { %v1608_v26 = vpop.xlane.xlu0 %1607 }
 0x370   : > { %v1641_v36 = vmax.f32 %v1596_v8, %v1608_v26 }
 0x375   : > { %v1611_v27 = vpop.xlane.xlu1 %1610 }
 0x376   : > { %v1635_v9 = vmax.f32 %v1633_v12, %v1611_v27 }
 0x377   : > { %v1614_v56 = vpop.xlane.xlu0 %1613 }
 0x378   : > { %v1642_v41 = vmax.f32 %v1640_v6, %v1614_v56 }
 0x37d   : > { %v1617_v57 = vpop.xlane.xlu1 %1616 }
 0x37e   : > { %v1636_v37 = vmax.f32 %v1634_v1, %v1617_v57 }
 0x37f   : > { %v1620_v60 = vpop.xlane.xlu0 %1619 }
 0x380   : > { %v1643_v16 = vmax.f32 %v1641_v36, %v1620_v60 }
 0x385   : > { %v1623_v61 = vpop.xlane.xlu1 %1622 }
 0x386   : > { %v1637_v17 = vmax.f32 %v1635_v9, %v1623_v61 }
 0x387   : > { %v1626_v0 = vpop.xlane.xlu0 %1625 }
 0x388   : > { %v1644_v63 = vmax.f32 %v1642_v41, %v1626_v0 }
 0x389   : > { %v1629_v55 = vpop.xlane.xlu1 %1628 }
 0x38a   : > { %v1638_v47 = vmax.f32 %v1636_v37, %v1629_v55 }
 0x38b   : > { %v1632_v52 = vpop.xlane.xlu0 %1631 }
 0x38c   : > { %v3637_v4 = vmax.f32 %v1637_v17, %v1638_v47  ;;  %v1645_v21 = vmax.f32 %v1643_v16, %v1632_v52 }
 0x38e   : > { %v3639_v23 = vmax.f32 %v1644_v63, %v1645_v21  ;;  %v1647_v46 = vsub.f32 %v3541_v15, %v3637_v4  ;;  %v1648_v42 = vsub.f32 %v3543_v32, %v3637_v4  ;;  %v1651_v44 = vsub.f32 %v3553_v31, %v3637_v4 }
 0x38f   : > { %v1652_v8 = vsub.f32 %v3555_v2, %v3637_v4  ;;  %v1655_v31 = vsub.f32 %v3565_v43, %v3637_v4  ;;  %v1659_v61 = vsub.f32 %v3579_v14, %v3637_v4  ;;  %v1663_v14 = vsub.f32 %v3601_v18, %v3637_v4 }
 0x390   : > { %v1679_v11 = vmul.f32 1.442695, %v1647_v46  ;;  %v1681_v24 = vmul.f32 1.442695, %v1648_v42  ;;  %v1649_v25 = vsub.f32 %v3545_v29, %v3639_v23  ;;  %v1650_v26 = vsub.f32 %v3549_v34, %v3639_v23 }
 0x391   : > { %v1653_v15 = vsub.f32 %v3557_v5, %v3639_v23  ;;  %v1654_v32 = vsub.f32 %v3561_v35, %v3639_v23  ;;  %v1687_v56 = vmul.f32 1.442695, %v1651_v44  ;;  %v1689_v57 = vmul.f32 1.442695, %v1652_v8 }
 0x392   : > { %2766 = vpow2.f32 %v1679_v11  ;;  %v1683_v27 = vmul.f32 1.442695, %v1649_v25  ;;  %v1685_v2 = vmul.f32 1.442695, %v1650_v26  ;;  %v1656_v29 = vsub.f32 %v3567_v40, %v3637_v4 }
 0x393   : > { %2768 = vpow2.f32 %v1681_v24  ;;  %v1691_v34 = vmul.f32 1.442695, %v1653_v15  ;;  %v1657_v5 = vsub.f32 %v3569_v48, %v3639_v23  ;;  %v1693_v60 = vmul.f32 1.442695, %v1654_v32 }
 0x394   : > { %2770 = vpow2.f32 %v1683_v27  ;;  %v1658_v35 = vsub.f32 %v3573_v10, %v3639_v23  ;;  %v1695_v43 = vmul.f32 1.442695, %v1655_v31  ;;  %v1697_v12 = vmul.f32 1.442695, %v1656_v29 }
 0x395   : > { %2772 = vpow2.f32 %v1685_v2  ;;  %v1660_v40 = vsub.f32 %v3583_v51, %v3637_v4  ;;  %v1699_v1 = vmul.f32 1.442695, %v1657_v5  ;;  %v1661_v48 = vsub.f32 %v3589_v39, %v3639_v23 }
 0x396   : > { %2774 = vpow2.f32 %v1687_v56  ;;  %v1701_v0 = vmul.f32 1.442695, %v1658_v35  ;;  %v1662_v10 = vsub.f32 %v3595_v30, %v3639_v23  ;;  %v1703_v6 = vmul.f32 1.442695, %v1659_v61 }
 0x397   : > { %2776 = vpow2.f32 %v1689_v57  ;;  %v1705_v36 = vmul.f32 1.442695, %v1660_v40  ;;  %v1664_v51 = vsub.f32 %v3603_v19, %v3637_v4  ;;  %v1707_v37 = vmul.f32 1.442695, %v1661_v48 }
 0x398   : > { %2778 = vpow2.f32 %v1691_v34  ;;  %v1665_v39 = vsub.f32 %v3605_v58, %v3639_v23  ;;  %v1709_v30 = vmul.f32 1.442695, %v1662_v10  ;;  %v1666_v41 = vsub.f32 %v3609_v50, %v3639_v23 }
 0x399   : > { %2780 = vpow2.f32 %v1693_v60  ;;  %v1711_v19 = vmul.f32 1.442695, %v1663_v14  ;;  %v1667_v17 = vsub.f32 %v3613_v53, %v3637_v4  ;;  %v1713_v58 = vmul.f32 1.442695, %v1664_v51 }
 0x39a   : > { %2782 = vpow2.f32 %v1695_v43  ;;  %v1668_v52 = vsub.f32 %v3615_v38, %v3637_v4  ;;  %v1715_v21 = vmul.f32 1.442695, %v1665_v39  ;;  %v1669_v46 = vsub.f32 %v3617_v59, %v3639_v23 }
 0x39b   : > { %2784 = vpow2.f32 %v1697_v12  ;;  %v1717_v53 = vmul.f32 1.442695, %v1666_v41  ;;  %v1670_v44 = vsub.f32 %v3621_v3, %v3639_v23  ;;  %v1719_v11 = vmul.f32 1.442695, %v1667_v17 }
 0x39c   : > { %v3677_v9 = vpop.eup %2766  ;;  %2786 = vpow2.f32 %v1699_v1  ;;  %v1671_v24 = vsub.f32 %v3625_v7, %v3637_v4  ;;  %v1721_v59 = vmul.f32 1.442695, %v1668_v52  ;;  %v1672_v26 = vsub.f32 %v3627_v45, %v3637_v4 }
 0x39d   : > { %v3681_v55 = vpop.eup %2768  ;;  %2788 = vpow2.f32 %v1701_v0  ;;  %v1723_v32 = vmul.f32 1.442695, %v1669_v46  ;;  %v1673_v31 = vsub.f32 %v3629_v20, %v3639_v23  ;;  %v1725_v7 = vmul.f32 1.442695, %v1670_v44 }
 0x39e   : > { %v3685_v18 = vpop.eup %2770  ;;  %v1743_v16 = vadd.f32 %v3681_v55, %v3677_v9  ;;  %2790 = vpow2.f32 %v1703_v6  ;;  %v1674_v2 = vsub.f32 %v3633_v22, %v3639_v23  ;;  %v1727_v57 = vmul.f32 1.442695, %v1671_v24 }
 0x39f   : > { %v3691_v47 = vpop.eup %2772  ;;  %2792 = vpow2.f32 %v1705_v36  ;;  %v1675_v29 = vsub.f32 %v3577_v13, %v3637_v4  ;;  %v1729_v20 = vmul.f32 1.442695, %v1672_v26  ;;  %v1676_v5 = vsub.f32 %v3581_v49, %v3637_v4 }
 0x3a0   : > { %v3695_v63 = vpop.eup %2774  ;;  %1744 = vadd.xlane.f32.xlu1 %v1743_v16  ;;  %v1746_v50 = vadd.f32 %v3691_v47, %v3685_v18  ;;  %2794 = vpow2.f32 %v1707_v37  ;;  %v1731_v35 = vmul.f32 1.442695, %v1673_v31  ;;  %v1677_v43 = vsub.f32 %v3585_v54, %v3639_v23 }
 0x3a1   : > { %v3701_v42 = vpop.eup %2776  ;;  %2796 = vpow2.f32 %v1709_v30  ;;  %v1733_v13 = vmul.f32 1.442695, %v1674_v2  ;;  %v1678_v12 = vsub.f32 %v3593_v28, %v3639_v23  ;;  %v1735_v4 = vmul.f32 1.442695, %v1675_v29 }
 0x3a2   : > { %v3705_v8 = vpop.eup %2778  ;;  %1747 = vadd.xlane.f32.xlu0 %v1746_v50  ;;  %v1749_v38 = vadd.f32 %v3701_v42, %v3695_v63  ;;  %2798 = vpow2.f32 %v1711_v19  ;;  %v1737_v48 = vmul.f32 1.442695, %v1676_v5  ;;  %v1739_v28 = vmul.f32 1.442695, %v1677_v43 }
 0x3a3   : > { %v3711_v25 = vpop.eup %2780  ;;  %2800 = vpow2.f32 %v1713_v58  ;;  %v1741_v10 = vmul.f32 1.442695, %v1678_v12 }
 0x3a4   : > { %v3715_v15 = vpop.eup %2782  ;;  %1750 = vadd.xlane.f32.xlu1 %v1749_v38  ;;  %v1752_v3 = vadd.f32 %v3711_v25, %v3705_v8  ;;  %2802 = vpow2.f32 %v1715_v21 }
 0x3a5   : > { %v3721_v27 = vpop.eup %2784  ;;  %2804 = vpow2.f32 %v1717_v53 }
 0x3a6   : > { %v3725_v56 = vpop.eup %2786  ;;  %1753 = vadd.xlane.f32.xlu0 %v1752_v3  ;;  %v1755_v45 = vadd.f32 %v3721_v27, %v3715_v15  ;;  %2806 = vpow2.f32 %v1719_v11 }
 0x3a7   : > { %v3731_v34 = vpop.eup %2788  ;;  %2808 = vpow2.f32 %v1721_v59 }
 0x3a8   : > { %v3735_v60 = vpop.eup %2790  ;;  %1756 = vadd.xlane.f32.xlu1 %v1755_v45  ;;  %v1758_v22 = vadd.f32 %v3731_v34, %v3725_v56  ;;  %2810 = vpow2.f32 %v1723_v32 }
 0x3a9   : > { %v3741_v61 = vpop.eup %2792  ;;  %2812 = vpow2.f32 %v1725_v7 }
 0x3aa   : > { %v3745_v40 = vpop.eup %2794  ;;  %1759 = vadd.xlane.f32.xlu0 %v1758_v22  ;;  %v1761_v49 = vadd.f32 %v3741_v61, %v3735_v60  ;;  %2814 = vpow2.f32 %v1727_v57 }
 0x3ab   : > { %v3749_v1 = vpop.eup %2796  ;;  %2816 = vpow2.f32 %v1729_v20 }
 0x3ac   : > { %v3751_v54 = vpop.eup %2798  ;;  %1762 = vadd.xlane.f32.xlu1 %v1761_v49  ;;  %v1764_v0 = vadd.f32 %v3749_v1, %v3745_v40  ;;  %2818 = vpow2.f32 %v1731_v35 }
 0x3ad   : > { %v3755_v23 = vpop.eup %2800  ;;  %2820 = vpow2.f32 %v1733_v13 }
 0x3ae   : > { %v3757_v6 = vpop.eup %2802  ;;  %1765 = vadd.xlane.f32.xlu0 %v1764_v0  ;;  %v1767_v14 = vadd.f32 %v3755_v23, %v3751_v54  ;;  %2822 = vpow2.f32 %v1735_v4 }
 0x3af   : > { %v3761_v36 = vpop.eup %2804  ;;  %2824 = vpow2.f32 %v1737_v48 }
 0x3b0   : > { %v3763_v51 = vpop.eup %2806  ;;  %1768 = vadd.xlane.f32.xlu1 %v1767_v14  ;;  %v1770_v37 = vadd.f32 %v3761_v36, %v3757_v6  ;;  %2826 = vpow2.f32 %v1739_v28 }
 0x3b1   : > { %v3767_v39 = vpop.eup %2808  ;;  %2828 = vpow2.f32 %v1741_v10 }
 0x3b2   : > { %v3769_v30 = vpop.eup %2810  ;;  %1771 = vadd.xlane.f32.xlu0 %v1770_v37  ;;  %v1773_v41 = vadd.f32 %v3767_v39, %v3763_v51 }
 0x3b3   : > { %v3773_v16 = vpop.eup %2812 }
 0x3b4   : > { %v3775_v19 = vpop.eup %2814  ;;  %1774 = vadd.xlane.f32.xlu1 %v1773_v41  ;;  %v1776_v17 = vadd.f32 %v3773_v16, %v3769_v30 }
 0x3b5   : > { %v3779_v58 = vpop.eup %2816 }
 0x3b6   : > { %v3781_v52 = vpop.eup %2818  ;;  %1777 = vadd.xlane.f32.xlu0 %v1776_v17  ;;  %v1779_v50 = vadd.f32 %v3779_v58, %v3775_v19 }
 0x3b7   : > { %v3785_v21 = vpop.eup %2820 }
 0x3b8   : > { %v3787_v46 = vpop.eup %2822  ;;  %1780 = vadd.xlane.f32.xlu1 %v1779_v50  ;;  %v1782_v53 = vadd.f32 %v3785_v21, %v3781_v52 }
 0x3b9   : > { %v3791_v44 = vpop.eup %2824 }
 0x3ba   : > { %v3793_v38 = vpop.eup %2826  ;;  %1783 = vadd.xlane.f32.xlu0 %v1782_v53  ;;  %v1785_v11 = vadd.f32 %v3791_v44, %v3787_v46 }
 0x3bb   : > { %v3797_v24 = vpop.eup %2828 }
 0x3bc   : > { %1786 = vadd.xlane.f32.xlu1 %v1785_v11  ;;  %v1788_v59 = vadd.f32 %v3797_v24, %v3793_v38 }
 0x3be   : > { %1789 = vadd.xlane.f32.xlu0 %v1788_v59 }
 0x42d   : > { %v1745_v26 = vpop.xlane.xlu1 %1744 }
 0x42f   : > { %v1748_v3 = vpop.xlane.xlu0 %1747 }
 0x431   : > { %v1751_v32 = vpop.xlane.xlu1 %1750 }
 0x432   : > { %v1791_v20 = vadd.f32 %v1751_v32, %v1745_v26 }
 0x433   : > { %v1754_v31 = vpop.xlane.xlu0 %1753 }
 0x434   : > { %v1798_v22 = vadd.f32 %v1754_v31, %v1748_v3 }
 0x435   : > { %v1757_v7 = vpop.xlane.xlu1 %1756 }
 0x436   : > { %v1792_v35 = vadd.f32 %v1791_v20, %v1757_v7 }
 0x437   : > { %v1760_v2 = vpop.xlane.xlu0 %1759 }
 0x438   : > { %v1799_v13 = vadd.f32 %v1798_v22, %v1760_v2 }
 0x439   : > { %v1763_v45 = vpop.xlane.xlu1 %1762 }
 0x43a   : > { %v1793_v12 = vadd.f32 %v1792_v35, %v1763_v45 }
 0x43b   : > { %v1766_v57 = vpop.xlane.xlu0 %1765 }
 0x43c   : > { %v1800_v4 = vadd.f32 %v1799_v13, %v1766_v57 }
 0x43d   : > { %v1769_v29 = vpop.xlane.xlu1 %1768 }
 0x43e   : > { %v1794_v48 = vadd.f32 %v1793_v12, %v1769_v29 }
 0x43f   : > { %v1772_v5 = vpop.xlane.xlu0 %1771 }
 0x440   : > { %v1801_v28 = vadd.f32 %v1800_v4, %v1772_v5 }
 0x441   : > { %v1775_v43 = vpop.xlane.xlu1 %1774 }
 0x442   : > { %v1795_v10 = vadd.f32 %v1794_v48, %v1775_v43 }
 0x443   : > { %v1778_v49 = vpop.xlane.xlu0 %1777 }
 0x444   : > { %v1802_v37 = vadd.f32 %v1801_v28, %v1778_v49 }
 0x445   : > { %v1781_v0 = vpop.xlane.xlu1 %1780 }
 0x446   : > { %v1796_v41 = vadd.f32 %v1795_v10, %v1781_v0 }
 0x447   : > { %v1784_v14 = vpop.xlane.xlu0 %1783 }
 0x448   : > { %v1803_v50 = vadd.f32 %v1802_v37, %v1784_v14 }
 0x449   : > { %v1787_v17 = vpop.xlane.xlu1 %1786 }
 0x44a   : > { %v1797_v53 = vadd.f32 %v1796_v41, %v1787_v17 }
 0x44b   : > { %v1790_v11 = vpop.xlane.xlu0 %1789 }
 0x44c   : > { %2830 = vrcp.f32 %v1797_v53  ;;  %v1804_v59 = vadd.f32 %v1803_v50, %v1790_v11 }
 0x44e   : > { %2832 = vrcp.f32 %v1804_v59 }
 0x456   : > { %v2831_v26 = vpop.eup %2830 }
 0x457   : > { %v1806_v3 = vmul.f32 %v2831_v26, %v3677_v9  ;;  %v3803_v32 = vmul.f32 %v2831_v26, %v3681_v55  ;;  %v1811_v31 = vmul.f32 %v2831_v26, %v3695_v63  ;;  %v3807_v7 = vmul.f32 %v2831_v26, %v3701_v42 }
 0x458   : > { %v2833_v2 = vpop.eup %2832  ;;  %v1815_v45 = vmul.f32 %v2831_v26, %v3715_v15  ;;  %v3811_v57 = vmul.f32 %v2831_v26, %v3721_v27  ;;  %v1819_v29 = vmul.f32 %v2831_v26, %v3735_v60  ;;  %v3815_v20 = vmul.f32 %v2831_v26, %v3741_v61 }
 0x459   : > { %v3818_v9 = vmul.f32 %v2833_v2, %v3685_v18  ;;  %v3821_v55 = vmul.f32 %v2833_v2, %v3691_v47  ;;  %v3824_v63 = vmul.f32 %v2833_v2, %v3705_v8  ;;  %v3827_v42 = vmul.f32 %v2833_v2, %v3711_v25 }
 0x45a   : > { %v3830_v15 = vmul.f32 %v2833_v2, %v3725_v56  ;;  %v3833_v27 = vmul.f32 %v2833_v2, %v3731_v34  ;;  %v3836_v60 = vmul.f32 %v2833_v2, %v3745_v40  ;;  %v3839_v18 = vmul.f32 %v2833_v2, %v3749_v1 }
 0x45b   : > { %v1823_v47 = vmul.f32 %v2831_v26, %v3751_v54  ;;  %v3843_v8 = vmul.f32 %v2831_v26, %v3755_v23  ;;  %v3846_v25 = vmul.f32 %v2833_v2, %v3757_v6  ;;  %v3849_v56 = vmul.f32 %v2833_v2, %v3761_v36 }
 0x45c   : > { %v1827_v34 = vmul.f32 %v2831_v26, %v3763_v51  ;;  %v3853_v61 = vmul.f32 %v2831_v26, %v3767_v39  ;;  %v3856_v40 = vmul.f32 %v2833_v2, %v3769_v30  ;;  %v3859_v1 = vmul.f32 %v2833_v2, %v3773_v16 }
 0x45d   : > { %v1831_v54 = vmul.f32 %v2831_v26, %v3775_v19  ;;  %v3863_v23 = vmul.f32 %v2831_v26, %v3779_v58  ;;  %v3866_v6 = vmul.f32 %v2833_v2, %v3781_v52  ;;  %v3869_v36 = vmul.f32 %v2833_v2, %v3785_v21 }
 0x45e   : > { %v1835_v51 = vmul.f32 %v2831_v26, %v3787_v46  ;;  %v3873_v39 = vmul.f32 %v2831_v26, %v3791_v44  ;;  %v3876_v30 = vmul.f32 %v2833_v2, %v3793_v38  ;;  %v3879_v16 = vmul.f32 %v2833_v2, %v3797_v24 }
 0x45f   : > { %v1839_v19 = vcombine.low %v1806_v3, %v1815_v45  ;;  %v1840_v58 = vcombine.high %v1806_v3, %v1815_v45  ;;  %v1855_v5 = vcombine.low %v1811_v31, %v1819_v29  ;;  %v1856_v22 = vcombine.high %v1811_v31, %v1819_v29 }
 0x460   : > { %v1871_v52 = vcombine.low %v1823_v47, %v1831_v54  ;;  %v1872_v35 = vcombine.high %v1823_v47, %v1831_v54  ;;  %v1887_v21 = vcombine.low %v1827_v34, %v1835_v51  ;;  %v1888_v43 = vcombine.high %v1827_v34, %v1835_v51 }
 0x461   : > { %v1847_v46 = vrot.slane %v1839_v19, %v3415_v62  ;;  %v1854_v44 = vrot.slane %v1840_v58, %v3415_v62  ;;  %v1863_v13 = vrot.slane %v1855_v5, %v3415_v62  ;;  %v1870_v38 = vrot.slane %v1856_v22, %v3415_v62 }
 0x462   : > { %v1879_v24 = vrot.slane %v1871_v52, %v3415_v62  ;;  %v1886_v12 = vrot.slane %v1872_v35, %v3415_v62  ;;  %v1895_v49 = vrot.slane %v1887_v21, %v3415_v62  ;;  %v1902_v4 = vrot.slane %v1888_v43, %v3415_v62 }
 0x463   : > { %v1903_v48 = vcombine.low %v1847_v46, %v1863_v13  ;;  %v1904_v0 = vcombine.high %v1847_v46, %v1863_v13  ;;  %v1919_v28 = vcombine.low %v1854_v44, %v1870_v38  ;;  %v1920_v10 = vcombine.high %v1854_v44, %v1870_v38 }
 0x464   : > { %v1935_v14 = vcombine.low %v1879_v24, %v1895_v49  ;;  %v1936_v37 = vcombine.high %v1879_v24, %v1895_v49  ;;  %v1951_v41 = vcombine.low %v1886_v12, %v1902_v4  ;;  %v1952_v17 = vcombine.high %v1886_v12, %v1902_v4 }
 0x465   : > { %v1911_v50 = vrot.slane %v1903_v48, %v3417_v33  ;;  %v1918_v53 = vrot.slane %v1904_v0, %v3417_v33  ;;  %v1927_v11 = vrot.slane %v1919_v28, %v3417_v33  ;;  %v1934_v59 = vrot.slane %v1920_v10, %v3417_v33 }
 0x466   : > { %v1943_v26 = vrot.slane %v1935_v14, %v3417_v33  ;;  %v1950_v3 = vrot.slane %v1936_v37, %v3417_v33  ;;  %v1959_v31 = vrot.slane %v1951_v41, %v3417_v33  ;;  %v1966_v2 = vrot.slane %v1952_v17, %v3417_v33 }
 0x467   : > { %v1975_v45 = vcombine.low %v3818_v9, %v3830_v15  ;;  %v1976_v29 = vcombine.high %v3818_v9, %v3830_v15  ;;  %v1991_v47 = vcombine.low %v3824_v63, %v3836_v60  ;;  %v1992_v34 = vcombine.high %v3824_v63, %v3836_v60 }
 0x468   : > { %v1967_v54 = vcombine.low %v1911_v50, %v1943_v26  ;;  %v1968_v51 = vcombine.high %v1911_v50, %v1943_v26  ;;  %v1969_v19 = vcombine.low %v1918_v53, %v1950_v3  ;;  %v1970_v58 = vcombine.high %v1918_v53, %v1950_v3 }
 0x469   : > { %v1971_v5 = vcombine.low %v1927_v11, %v1959_v31  ;;  %v1972_v22 = vcombine.high %v1927_v11, %v1959_v31  ;;  %v1973_v52 = vcombine.low %v1934_v59, %v1966_v2  ;;  %v1974_v35 = vcombine.high %v1934_v59, %v1966_v2 }
 0x46a   : > { %v1983_v21 = vrot.slane %v1975_v45, %v3415_v62  ;;  %v1990_v43 = vrot.slane %v1976_v29, %v3415_v62  ;;  %v1999_v9 = vrot.slane %v1991_v47, %v3415_v62  ;;  %v2006_v15 = vrot.slane %v1992_v34, %v3415_v62  ;;  %2383 = vst [vmem:[%s3910_s18] sm:$0xff] %v1967_v54 }
 0x46b   : > { %2385 = vst [vmem:[%s3910_s18 + $0x10] sm:$0xff] %v1968_v51  ;;  %2387 = vst [vmem:[%s3910_s18 + $0x20] sm:$0xff] %v1969_v19  ;;  %v2007_v63 = vcombine.low %v3846_v25, %v3866_v6  ;;  %v2008_v60 = vcombine.high %v3846_v25, %v3866_v6  ;;  %v2023_v46 = vcombine.low %v3856_v40, %v3876_v30 }
 0x46c   : > { %2389 = vst [vmem:[%s3910_s18 + $0x30] sm:$0xff] %v1970_v58  ;;  %v2024_v44 = vcombine.high %v3856_v40, %v3876_v30  ;;  %2391 = vst [vmem:[%s3910_s18 + $0x40] sm:$0xff] %v1971_v5  ;;  %v2039_v13 = vcombine.low %v1983_v21, %v1999_v9  ;;  %v2040_v38 = vcombine.high %v1983_v21, %v1999_v9 }
 0x46d   : > { %2393 = vst [vmem:[%s3910_s18 + $0x50] sm:$0xff] %v1972_v22  ;;  %2395 = vst [vmem:[%s3910_s18 + $0x60] sm:$0xff] %v1973_v52  ;;  %v2055_v24 = vcombine.low %v1990_v43, %v2006_v15  ;;  %v2056_v12 = vcombine.high %v1990_v43, %v2006_v15  ;;  %v2015_v49 = vrot.slane %v2007_v63, %v3415_v62 }
 0x46e   : > { %2397 = vst [vmem:[%s3910_s18 + $0x70] sm:$0xff] %v1974_v35  ;;  %v2022_v4 = vrot.slane %v2008_v60, %v3415_v62  ;;  %v2031_v25 = vrot.slane %v2023_v46, %v3415_v62  ;;  %v2038_v6 = vrot.slane %v2024_v44, %v3415_v62  ;;  %v2047_v48 = vrot.slane %v2039_v13, %v3417_v33 }
 0x46f   : > { %v2054_v40 = vrot.slane %v2040_v38, %v3417_v33  ;;  %v2063_v30 = vrot.slane %v2055_v24, %v3417_v33  ;;  %v2070_v0 = vrot.slane %v2056_v12, %v3417_v33  ;;  %v2111_v41 = vcombine.low %v3803_v32, %v3811_v57 }
 0x470   : > { %v2071_v28 = vcombine.low %v2015_v49, %v2031_v25  ;;  %v2072_v10 = vcombine.high %v2015_v49, %v2031_v25  ;;  %v2087_v14 = vcombine.low %v2022_v4, %v2038_v6  ;;  %v2088_v37 = vcombine.high %v2022_v4, %v2038_v6 }
 0x471   : > { %v2112_v17 = vcombine.high %v3803_v32, %v3811_v57  ;;  %v2127_v50 = vcombine.low %v3807_v7, %v3815_v20  ;;  %v2128_v53 = vcombine.high %v3807_v7, %v3815_v20  ;;  %v2119_v31 = vrot.slane %v2111_v41, %v3415_v62 }
 0x472   : > { %v2079_v11 = vrot.slane %v2071_v28, %v3417_v33  ;;  %v2086_v59 = vrot.slane %v2072_v10, %v3417_v33  ;;  %v2095_v26 = vrot.slane %v2087_v14, %v3417_v33  ;;  %v2102_v3 = vrot.slane %v2088_v37, %v3417_v33 }
 0x473   : > { %v2126_v2 = vrot.slane %v2112_v17, %v3415_v62  ;;  %v2135_v32 = vrot.slane %v2127_v50, %v3415_v62  ;;  %v2142_v57 = vrot.slane %v2128_v53, %v3415_v62  ;;  %v2143_v19 = vcombine.low %v3843_v8, %v3863_v23 }
 0x474   : > { %v2103_v7 = vcombine.low %v2047_v48, %v2079_v11  ;;  %v2104_v20 = vcombine.high %v2047_v48, %v2079_v11  ;;  %v2105_v45 = vcombine.low %v2054_v40, %v2086_v59  ;;  %v2106_v29 = vcombine.high %v2054_v40, %v2086_v59 }
 0x475   : > { %v2107_v47 = vcombine.low %v2063_v30, %v2095_v26  ;;  %v2108_v34 = vcombine.high %v2063_v30, %v2095_v26  ;;  %v2109_v54 = vcombine.low %v2070_v0, %v2102_v3  ;;  %v2110_v51 = vcombine.high %v2070_v0, %v2102_v3 }
 0x476   : > { %v2144_v58 = vcombine.high %v3843_v8, %v3863_v23  ;;  %v2159_v5 = vcombine.low %v3853_v61, %v3873_v39  ;;  %v2160_v22 = vcombine.high %v3853_v61, %v3873_v39  ;;  %2399 = vst [vmem:[%s3910_s18 + $0x80] sm:$0xff] %v2103_v7  ;;  %2401 = vst [vmem:[%s3910_s18 + $0x90] sm:$0xff] %v2104_v20 }
 0x477   : > { %2403 = vst [vmem:[%s3910_s18 + $0xa0] sm:$0xff] %v2105_v45  ;;  %2405 = vst [vmem:[%s3910_s18 + $0xb0] sm:$0xff] %v2106_v29  ;;  %v2175_v52 = vcombine.low %v2119_v31, %v2135_v32  ;;  %v2176_v35 = vcombine.high %v2119_v31, %v2135_v32  ;;  %v2191_v21 = vcombine.low %v2126_v2, %v2142_v57 }
 0x478   : > { %v2192_v43 = vcombine.high %v2126_v2, %v2142_v57  ;;  %2407 = vst [vmem:[%s3910_s18 + $0xc0] sm:$0xff] %v2107_v47  ;;  %2409 = vst [vmem:[%s3910_s18 + $0xd0] sm:$0xff] %v2108_v34  ;;  %v2151_v8 = vrot.slane %v2143_v19, %v3415_v62  ;;  %v2158_v23 = vrot.slane %v2144_v58, %v3415_v62 }
 0x479   : > { %2411 = vst [vmem:[%s3910_s18 + $0xe0] sm:$0xff] %v2109_v54  ;;  %2413 = vst [vmem:[%s3910_s18 + $0xf0] sm:$0xff] %v2110_v51  ;;  %v2167_v9 = vrot.slane %v2159_v5, %v3415_v62  ;;  %v2174_v61 = vrot.slane %v2160_v22, %v3415_v62  ;;  %v2183_v39 = vrot.slane %v2175_v52, %v3417_v33 }
 0x47a   : > { %v2190_v15 = vrot.slane %v2176_v35, %v3417_v33  ;;  %v2199_v63 = vrot.slane %v2191_v21, %v3417_v33  ;;  %v2206_v60 = vrot.slane %v2192_v43, %v3417_v33  ;;  %v2247_v24 = vcombine.low %v3821_v55, %v3833_v27 }
 0x47b   : > { %v2207_v46 = vcombine.low %v2151_v8, %v2167_v9  ;;  %v2208_v44 = vcombine.high %v2151_v8, %v2167_v9  ;;  %v2223_v13 = vcombine.low %v2158_v23, %v2174_v61  ;;  %v2224_v38 = vcombine.high %v2158_v23, %v2174_v61 }
 0x47c   : > { %v2248_v12 = vcombine.high %v3821_v55, %v3833_v27  ;;  %v2263_v49 = vcombine.low %v3827_v42, %v3839_v18  ;;  %v2264_v4 = vcombine.high %v3827_v42, %v3839_v18  ;;  %v2255_v30 = vrot.slane %v2247_v24, %v3415_v62 }
 0x47d   : > { %v2215_v25 = vrot.slane %v2207_v46, %v3417_v33  ;;  %v2222_v6 = vrot.slane %v2208_v44, %v3417_v33  ;;  %v2231_v48 = vrot.slane %v2223_v13, %v3417_v33  ;;  %v2238_v40 = vrot.slane %v2224_v38, %v3417_v33 }
 0x47e   : > { %v2262_v0 = vrot.slane %v2248_v12, %v3415_v62  ;;  %v2271_v55 = vrot.slane %v2263_v49, %v3415_v62  ;;  %v2278_v27 = vrot.slane %v2264_v4, %v3415_v62  ;;  %v2279_v50 = vcombine.low %v3849_v56, %v3869_v36 }
 0x47f   : > { %v2239_v42 = vcombine.low %v2183_v39, %v2215_v25  ;;  %v2240_v18 = vcombine.high %v2183_v39, %v2215_v25  ;;  %v2241_v28 = vcombine.low %v2190_v15, %v2222_v6  ;;  %v2242_v10 = vcombine.high %v2190_v15, %v2222_v6 }
 0x480   : > { %v2243_v14 = vcombine.low %v2199_v63, %v2231_v48  ;;  %v2244_v37 = vcombine.high %v2199_v63, %v2231_v48  ;;  %v2245_v41 = vcombine.low %v2206_v60, %v2238_v40  ;;  %v2246_v17 = vcombine.high %v2206_v60, %v2238_v40 }
 0x481   : > { %v2280_v53 = vcombine.high %v3849_v56, %v3869_v36  ;;  %v2295_v11 = vcombine.low %v3859_v1, %v3879_v16  ;;  %v2296_v59 = vcombine.high %v3859_v1, %v3879_v16  ;;  %2384 = vst [vmem:[%s3910_s18 + $0x8] sm:$0xff] %v2239_v42  ;;  %2386 = vst [vmem:[%s3910_s18 + $0x18] sm:$0xff] %v2240_v18 }
 0x482   : > { %2388 = vst [vmem:[%s3910_s18 + $0x28] sm:$0xff] %v2241_v28  ;;  %2390 = vst [vmem:[%s3910_s18 + $0x38] sm:$0xff] %v2242_v10  ;;  %v2311_v26 = vcombine.low %v2255_v30, %v2271_v55  ;;  %v2312_v3 = vcombine.high %v2255_v30, %v2271_v55  ;;  %v2327_v31 = vcombine.low %v2262_v0, %v2278_v27 }
 0x483   : > { %v2328_v2 = vcombine.high %v2262_v0, %v2278_v27  ;;  %2392 = vst [vmem:[%s3910_s18 + $0x48] sm:$0xff] %v2243_v14  ;;  %2394 = vst [vmem:[%s3910_s18 + $0x58] sm:$0xff] %v2244_v37  ;;  %v2287_v56 = vrot.slane %v2279_v50, %v3415_v62  ;;  %v2294_v36 = vrot.slane %v2280_v53, %v3415_v62 }
 0x484   : > { %2396 = vst [vmem:[%s3910_s18 + $0x68] sm:$0xff] %v2245_v41  ;;  %2398 = vst [vmem:[%s3910_s18 + $0x78] sm:$0xff] %v2246_v17  ;;  %v2303_v1 = vrot.slane %v2295_v11, %v3415_v62  ;;  %v2310_v16 = vrot.slane %v2296_v59, %v3415_v62  ;;  %v2319_v32 = vrot.slane %v2311_v26, %v3417_v33 }
 0x485   : > { %v2326_v57 = vrot.slane %v2312_v3, %v3417_v33  ;;  %v2335_v47 = vrot.slane %v2327_v31, %v3417_v33  ;;  %v2342_v34 = vrot.slane %v2328_v2, %v3417_v33 }
 0x486   : > { %v2343_v7 = vcombine.low %v2287_v56, %v2303_v1  ;;  %v2344_v20 = vcombine.high %v2287_v56, %v2303_v1  ;;  %v2359_v45 = vcombine.low %v2294_v36, %v2310_v16  ;;  %v2360_v29 = vcombine.high %v2294_v36, %v2310_v16 }
 0x488   : > { %v2351_v54 = vrot.slane %v2343_v7, %v3417_v33  ;;  %v2358_v51 = vrot.slane %v2344_v20, %v3417_v33  ;;  %v2367_v62 = vrot.slane %v2359_v45, %v3417_v33  ;;  %v2374_v19 = vrot.slane %v2360_v29, %v3417_v33 }
 0x48a   : > { %v2375_v58 = vcombine.low %v2319_v32, %v2351_v54  ;;  %v2376_v5 = vcombine.high %v2319_v32, %v2351_v54  ;;  %v2377_v22 = vcombine.low %v2326_v57, %v2358_v51  ;;  %v2378_v52 = vcombine.high %v2326_v57, %v2358_v51 }
 0x48b   : > { %v2379_v35 = vcombine.low %v2335_v47, %v2367_v62  ;;  %v2380_v21 = vcombine.high %v2335_v47, %v2367_v62  ;;  %v2381_v43 = vcombine.low %v2342_v34, %v2374_v19  ;;  %v2382_v33 = vcombine.high %v2342_v34, %v2374_v19 }
 0x48c   : > { %2400 = vst [vmem:[%s3910_s18 + $0x88] sm:$0xff] %v2375_v58  ;;  %2402 = vst [vmem:[%s3910_s18 + $0x98] sm:$0xff] %v2376_v5 }
 0x48d   : > { %2404 = vst [vmem:[%s3910_s18 + $0xa8] sm:$0xff] %v2377_v22  ;;  %2406 = vst [vmem:[%s3910_s18 + $0xb8] sm:$0xff] %v2378_v52 }
 0x48e   : > { %2408 = vst [vmem:[%s3910_s18 + $0xc8] sm:$0xff] %v2379_v35  ;;  %2410 = vst [vmem:[%s3910_s18 + $0xd8] sm:$0xff] %v2380_v21 }
 0x48f   : > { %2412 = vst [vmem:[%s3910_s18 + $0xe8] sm:$0xff] %v2381_v43  ;;  %2414 = vst [vmem:[%s3910_s18 + $0xf8] sm:$0xff] %v2382_v33 }
 0x490   : > { %2907 = shalt.err (!%p2904_p9)
}
 0x491   : > { %s2908_s29 = scalar_lea.hbm %s4025_s28, 4096  ;;  %s2912_s9 = scalar_lea.hbm %s4091_s6, 8192 }
 0x492   : > { %p2909_p1 = scmp.ne.s32.totalorder %s4025_s28, %s2908_s29  ;;  %p2913_p5 = scmp.lt.u32.totalorder %s4025_s28, %s4091_s6 }
 0x493   : > { %p2914_p4 = scmp.lt.u32.totalorder %s2912_s9, %s2908_s29  ;;  %p2916_p0 = scmp.lt.u32.totalorder %s2908_s29, %s4025_s28 }
 0x494   : > { %p2910_p6 = pnand %p2909_p1, %p4109_p3 }
 0x495   : > { %p2915_p8 = por %p2914_p4, %p2913_p5 }
 0x496   : > { %p2911_p2 = pneg %p2910_p6 }
 0x497   : > { %p2917_p11 = por %p2916_p0, %p2915_p8 }
 0x499   : > { %p2918_p13 = pnand %p2917_p11, %p2911_p2 }
 0x49b   : > { %2921 = shalt.err (!%p2918_p13)
}
 0x49c   : > { %s3001_s24 = smov 256  }
 0x49d   : > { %2643 = dma.vmem_to_hbm [thread:$0]  (%p4109_p3), %s4027_s0, 4096, %s4025_s28, %s2416_s20, %s3001_s24, %s3001_s24, %s2997_s13  }
 0x49e PF: > { %s2447_s8 = sand.u32 1, %s2960_s21   ;;  %p4110_p7 = scmp.ne.s32.totalorder %s4102_s12, 0 }
 0x49f   : > { %p4111_p10 = scmp.ge.s32.totalorder %s2980_s26, 2  ;;  %s2448_s27 = scalar_lea.sflag [#allocation5], %s2447_s8 }
 0x4a1   : > { %p2653_p12 = pnand %p4111_p10, %p4110_p7 }
 0x4a3   : > { %2955 = dma.done.wait (!%p2653_p12), %s2448_s27, 4096  }
 0x4a4   : > { %2957 = vsyncadd (!%p2653_p12), %s2448_s27, 4294963200  ;;  %s25_s26 = sadd.s32 1, %s2980_s26   ;;  %s4112_s10 = sld [smem:[#allocation12_spill]] }
 0x4a5   : > { %p22_p9 = scmp.ge.s32.totalorder %s25_s26, 4   ;;  %s4113_s21 = smov %s2964_s22 }
 0x4a6   : > { %s4114_s22 = smov %s2968_s23  ;;  %s4115_s23 = smov %s3093_s11 }
 0x4a7   : > { %s4116_s24 = smov %s2976_s25  ;;  %24 = sbr.rel (!%p22_p9) target bundleno = 10 (0xa), region = 106 }
 0x4aa   : > { %s4117_s25 = smov %s4112_s10 }
 0x4ae   :  { %2453 = vsyncpa [#allocation4], 1 }
 0x4af   :  { %2455 = vsyncpa [#allocation4 + $0x1], 1 }
 0x4b0   :  { %2456 = vsyncpa [#allocation7], 1 }
 0x4b1   :  { %2458 = vsyncpa [#allocation7 + $0x1], 1 }
 0x4b2   :  { %2459 = vsyncpa [#allocation5], 1 }
 0x4b3   :  { %2461 = vsyncpa [#allocation5 + $0x1], 1 }

</bundles_post_ra>
